<compile_context>
chip_gen: v7x
topology: tpu7x:2x2x1
jax: 0.10.0
libtpu: 0.0.40
codegen_flags: <defaults>
</compile_context>

<pallas_src>
import functools

import jax
import jax.numpy as jnp
from jax.experimental import pallas as pl
from jax.experimental.pallas import tpu as pltpu


def _round_up(n, m):
    return ((n + m - 1) // m) * m


def _mlp_kernel(x_ref, w1_ref, b1_ref, w2_ref, b2_ref, w3_ref, b3_ref, o_ref):
    # x arrives as f32 straight from HBM; cast to bf16 here (free VPU slot)
    # so the MXU sees bf16 operands while all accumulation stays f32.
    x = x_ref[...].astype(w1_ref.dtype)
    h = jnp.dot(x, w1_ref[...], preferred_element_type=jnp.float32) + b1_ref[...]
    h = jnp.maximum(h, 0.0).astype(w2_ref.dtype)      # f32 epilogue (v5e-safe)
    h = jnp.dot(h, w2_ref[...], preferred_element_type=jnp.float32) + b2_ref[...]
    h = jnp.maximum(h, 0.0).astype(w3_ref.dtype)
    y = jnp.dot(h, w3_ref[...], preferred_element_type=jnp.float32) + b3_ref[...]
    o_ref[...] = y.astype(o_ref.dtype)


@functools.partial(
    jax.jit, static_argnames=("block_rows", "fold", "compute_dtype", "out_dtype"))
def raynet2_forward(x, w1, b1, w2, b2, w3, b3, *, block_rows=8192, fold=16,
                    compute_dtype=jnp.bfloat16, out_dtype=jnp.float32):
    """Fused 3-layer MLP: x (B, d_in) f32 -> (B, d_out).

    `fold` rays are packed into the lane/K dimension via block-diagonal
    weights, so MXU contraction depths become fold*d_in / fold*h1 / fold*h2.
    fold=16 matches the 256-deep MXU of v6e/v7x for d_in=16 (use fold=8 on
    v5e, fold=1 for the plain per-ray layout).
    """
    B, d_in = x.shape
    h1 = w1.shape[1]
    h2 = w2.shape[1]
    d_out = w3.shape[1]

    # ---- fold rays into lanes: block-diagonal weights, tiled biases --------
    cd = compute_dtype
    eye = jnp.eye(fold, dtype=cd)
    w1b = jnp.kron(eye, w1.astype(cd))              # (fold*d_in, fold*h1)
    w2b = jnp.kron(eye, w2.astype(cd))              # (fold*h1,   fold*h2)
    w3b = jnp.kron(eye, w3.astype(cd))              # (fold*h2,   fold*d_out)
    b1b = jnp.tile(b1.astype(jnp.float32), (1, fold))
    b2b = jnp.tile(b2.astype(jnp.float32), (1, fold))
    b3b = jnp.tile(b3.astype(jnp.float32), (1, fold))
    k_in, n1 = w1b.shape
    n2 = w2b.shape[1]
    n_out = w3b.shape[1]

    # ---- batch tiling over folded rows --------------------------------------
    # Folded-row tile must be a multiple of 8 (sublane). For best perf the
    # caller should pass B as a multiple of fold*tb (no pad pass), and large
    # enough that the grid has >=2 steps so v7x's two TensorCores both work.
    b_fold = _round_up(pl.cdiv(B, fold), 8)
    tb = max(8, (min(block_rows // fold, b_fold) // 8) * 8)
    b_fold = _round_up(b_fold, tb)
    b_pad = b_fold * fold
    if b_pad != B:
        x = jnp.pad(x, ((0, b_pad - B), (0, 0)))
    xf = x.reshape(b_fold, k_in)                    # row-major -> free view

    grid = (b_fold // tb,)

    cd_bytes = jnp.dtype(cd).itemsize
    out_bytes = jnp.dtype(out_dtype).itemsize
    cost = pl.CostEstimate(
        flops=2 * b_fold * (k_in * n1 + n1 * n2 + n2 * n_out),
        transcendentals=0,
        bytes_accessed=(b_fold * k_in * 4                        # f32 x read
                        + (k_in * n1 + n1 * n2 + n2 * n_out) * cd_bytes
                        + (n1 + n2 + n_out) * 4                  # f32 biases
                        + b_fold * n_out * out_bytes),           # output write
    )

    # Weights/biases: full-array blocks with a constant index_map -> they stay
    # VMEM-resident across all batch tiles (total ~1.5 MiB in bf16).
    def resident(shape):
        return pl.BlockSpec(shape, lambda i: (0,) * len(shape))

    out = pl.pallas_call(
        _mlp_kernel,
        out_shape=jax.ShapeDtypeStruct((b_fold, n_out), out_dtype),
        grid=grid,
        in_specs=[
            pl.BlockSpec((tb, k_in), lambda i: (i, 0)),  # batch-tiled rays (f32)
            resident((k_in, n1)),
            resident((1, n1)),
            resident((n1, n2)),
            resident((1, n2)),
            resident((n2, n_out)),
            resident((1, n_out)),
        ],
        out_specs=pl.BlockSpec((tb, n_out), lambda i: (i, 0)),
        compiler_params=pltpu.CompilerParams(
            dimension_semantics=("parallel",),           # megacore on v7x
        ),
        cost_estimate=cost,
    )(xf, w1b, b1b, w2b, b2b, w3b, b3b)

    # Unfold: (b_fold, fold*d_out) -> (b_pad, d_out); row-major, free.
    return out.reshape(b_pad, d_out)[:B]


def init_params(key, d_in, hidden_sizes, d_out):
    """Deterministic init mimicking PyTorch nn.Linear default:
    U(-1/sqrt(fan_in), 1/sqrt(fan_in)) for both weight and bias."""
    sizes = [d_in] + list(hidden_sizes) + [d_out]
    params = []
    for fan_in, fan_out in zip(sizes[:-1], sizes[1:]):
        key, kw, kb = jax.random.split(key, 3)
        bound = 1.0 / jnp.sqrt(jnp.float32(fan_in))
        w = jax.random.uniform(kw, (fan_in, fan_out), jnp.float32, -bound, bound)
        b = jax.random.uniform(kb, (1, fan_out), jnp.float32, -bound, bound)
        params.extend([w, b])
    return params


def reference_forward(x, w1, b1, w2, b2, w3, b3, dot_dtype=None):
    cast = (lambda a: a.astype(dot_dtype)) if dot_dtype is not None else (lambda a: a)
    h1 = jnp.maximum(
        jnp.dot(cast(x), cast(w1), preferred_element_type=jnp.float32) + b1, 0.0)
    h2 = jnp.maximum(
        jnp.dot(cast(h1), cast(w2), preferred_element_type=jnp.float32) + b2, 0.0)
    return jnp.dot(cast(h2), cast(w3), preferred_element_type=jnp.float32) + b3


if __name__ == "__main__":
    key = jax.random.PRNGKey(0)
    k_x, k_p = jax.random.split(key)

    batch = 8
    d_in = 16
    hidden_sizes = [32, 64]  # RayNet2 default
    d_out = 8

    x = jax.random.normal(k_x, (batch, d_in), jnp.float32)
    w1, b1, w2, b2, w3, b3 = init_params(k_p, d_in, hidden_sizes, d_out)

    out = raynet2_forward(x, w1, b1, w2, b2, w3, b3)
    out = jax.block_until_ready(out)
    assert out.shape == (batch, d_out)
    assert out.dtype == jnp.float32

    # Check 1: reference mirroring the kernel's bf16 MXU operands (tight).
    ref_bf16 = reference_forward(x, w1, b1, w2, b2, w3, b3,
                                 dot_dtype=jnp.bfloat16)
    assert jnp.allclose(out, ref_bf16, atol=1e-2, rtol=1e-2)

    # Check 2: pure-f32 semantics of the original torch module (loose, bf16 noise).
    ref_f32 = reference_forward(x, w1, b1, w2, b2, w3, b3)
    assert jnp.allclose(out, ref_f32, atol=5e-2, rtol=5e-2)

    print("KERNEL_OK")
</pallas_src>

<mosaic_0001>
module attributes {stable_mosaic.version = 11 : i64} {
  func.func @_mlp_kernel(%arg0: i32, %arg1: memref<8x256xf32, #tpu.memory_space<vmem>>, %arg2: memref<256x512xbf16, #tpu.memory_space<vmem>>, %arg3: memref<1x512xf32, #tpu.memory_space<vmem>>, %arg4: memref<512x1024xbf16, #tpu.memory_space<vmem>>, %arg5: memref<1x1024xf32, #tpu.memory_space<vmem>>, %arg6: memref<1024x128xbf16, #tpu.memory_space<vmem>>, %arg7: memref<1x128xf32, #tpu.memory_space<vmem>>, %arg8: memref<8x128xf32, #tpu.memory_space<vmem>>) attributes {dimension_semantics = [#tpu.dimension_semantics<parallel>], iteration_bounds = array<i64: 1>, scalar_prefetch = 0 : i64, scratch_operands = 0 : i64, tpu.core_type = #tpu.core_type<tc>, window_params = [{transform_indices = @transform_0, window_bounds = array<i64: 8, 256>}, {pipeline_mode = #tpu.pipeline_mode<synchronous>, transform_indices = @transform_1, window_bounds = array<i64: 256, 512>}, {pipeline_mode = #tpu.pipeline_mode<synchronous>, transform_indices = @transform_2, window_bounds = array<i64: 1, 512>}, {pipeline_mode = #tpu.pipeline_mode<synchronous>, transform_indices = @transform_3, window_bounds = array<i64: 512, 1024>}, {pipeline_mode = #tpu.pipeline_mode<synchronous>, transform_indices = @transform_4, window_bounds = array<i64: 1, 1024>}, {pipeline_mode = #tpu.pipeline_mode<synchronous>, transform_indices = @transform_5, window_bounds = array<i64: 1024, 128>}, {pipeline_mode = #tpu.pipeline_mode<synchronous>, transform_indices = @transform_6, window_bounds = array<i64: 1, 128>}, {transform_indices = @transform_7, window_bounds = array<i64: 8, 128>}]} {
    %c0 = arith.constant 0 : index
    %c0_0 = arith.constant 0 : index
    %0 = vector.load %arg1[%c0, %c0_0] : memref<8x256xf32, #tpu.memory_space<vmem>>, vector<8x256xf32>
    %1 = arith.truncf %0 : vector<8x256xf32> to vector<8x256xbf16>
    %c0_1 = arith.constant 0 : index
    %c0_2 = arith.constant 0 : index
    %2 = vector.load %arg2[%c0_1, %c0_2] : memref<256x512xbf16, #tpu.memory_space<vmem>>, vector<256x512xbf16>
    %cst = arith.constant dense<0.000000e+00> : vector<8x512xf32>
    %3 = tpu.matmul %1, %2, %cst {dimension_numbers = #tpu.dot_dimension_numbers<[1], [0], [0], [1], [0, 0, 1, 1], [], []>} : vector<8x256xbf16>, vector<256x512xbf16>, vector<8x512xf32> -> vector<8x512xf32>
    %c0_3 = arith.constant 0 : index
    %c0_4 = arith.constant 0 : index
    %4 = vector.load %arg3[%c0_3, %c0_4] : memref<1x512xf32, #tpu.memory_space<vmem>>, vector<1x512xf32>
    %5 = vector.broadcast %4 : vector<1x512xf32> to vector<8x512xf32>
    %6 = arith.addf %3, %5 : vector<8x512xf32>
    %cst_5 = arith.constant 0.000000e+00 : f32
    %7 = vector.broadcast %cst_5 : f32 to vector<8x512xf32>
    %8 = arith.maximumf %6, %7 : vector<8x512xf32>
    %9 = arith.truncf %8 : vector<8x512xf32> to vector<8x512xbf16>
    %c0_6 = arith.constant 0 : index
    %c0_7 = arith.constant 0 : index
    %10 = vector.load %arg4[%c0_6, %c0_7] : memref<512x1024xbf16, #tpu.memory_space<vmem>>, vector<512x1024xbf16>
    %cst_8 = arith.constant dense<0.000000e+00> : vector<8x1024xf32>
    %11 = tpu.matmul %9, %10, %cst_8 {dimension_numbers = #tpu.dot_dimension_numbers<[1], [0], [0], [1], [0, 0, 1, 1], [], []>} : vector<8x512xbf16>, vector<512x1024xbf16>, vector<8x1024xf32> -> vector<8x1024xf32>
    %c0_9 = arith.constant 0 : index
    %c0_10 = arith.constant 0 : index
    %12 = vector.load %arg5[%c0_9, %c0_10] : memref<1x1024xf32, #tpu.memory_space<vmem>>, vector<1x1024xf32>
    %13 = vector.broadcast %12 : vector<1x1024xf32> to vector<8x1024xf32>
    %14 = arith.addf %11, %13 : vector<8x1024xf32>
    %cst_11 = arith.constant 0.000000e+00 : f32
    %15 = vector.broadcast %cst_11 : f32 to vector<8x1024xf32>
    %16 = arith.maximumf %14, %15 : vector<8x1024xf32>
    %17 = arith.truncf %16 : vector<8x1024xf32> to vector<8x1024xbf16>
    %c0_12 = arith.constant 0 : index
    %c0_13 = arith.constant 0 : index
    %18 = vector.load %arg6[%c0_12, %c0_13] : memref<1024x128xbf16, #tpu.memory_space<vmem>>, vector<1024x128xbf16>
    %cst_14 = arith.constant dense<0.000000e+00> : vector<8x128xf32>
    %19 = tpu.matmul %17, %18, %cst_14 {dimension_numbers = #tpu.dot_dimension_numbers<[1], [0], [0], [1], [0, 0, 1, 1], [], []>} : vector<8x1024xbf16>, vector<1024x128xbf16>, vector<8x128xf32> -> vector<8x128xf32>
    %c0_15 = arith.constant 0 : index
    %c0_16 = arith.constant 0 : index
    %20 = vector.load %arg7[%c0_15, %c0_16] : memref<1x128xf32, #tpu.memory_space<vmem>>, vector<1x128xf32>
    %21 = vector.broadcast %20 : vector<1x128xf32> to vector<8x128xf32>
    %22 = arith.addf %19, %21 : vector<8x128xf32>
    %c0_17 = arith.constant 0 : index
    %c0_18 = arith.constant 0 : index
    %23 = vector.load %arg8[%c0_17, %c0_18] : memref<8x128xf32, #tpu.memory_space<vmem>>, vector<8x128xf32>
    tpu.vector_store %arg8[%c0_17, %c0_18], %22 {strides = array<i32>} : memref<8x128xf32, #tpu.memory_space<vmem>>, vector<8x128xf32>,
    return
  }
  func.func @transform_0(%arg0: i32) -> (i32, i32) {
    %c0_i32 = arith.constant 0 : i32
    %c0_i32_0 = arith.constant 0 : i32
    return %arg0, %c0_i32 : i32, i32
  }
  func.func @transform_1(%arg0: i32) -> (i32, i32) {
    %c0_i32 = arith.constant 0 : i32
    %c0_i32_0 = arith.constant 0 : i32
    %c0_i32_1 = arith.constant 0 : i32
    return %c0_i32, %c0_i32_0 : i32, i32
  }
  func.func @transform_2(%arg0: i32) -> (i32, i32) {
    %c0_i32 = arith.constant 0 : i32
    %c0_i32_0 = arith.constant 0 : i32
    %c0_i32_1 = arith.constant 0 : i32
    return %c0_i32, %c0_i32_0 : i32, i32
  }
  func.func @transform_3(%arg0: i32) -> (i32, i32) {
    %c0_i32 = arith.constant 0 : i32
    %c0_i32_0 = arith.constant 0 : i32
    %c0_i32_1 = arith.constant 0 : i32
    return %c0_i32, %c0_i32_0 : i32, i32
  }
  func.func @transform_4(%arg0: i32) -> (i32, i32) {
    %c0_i32 = arith.constant 0 : i32
    %c0_i32_0 = arith.constant 0 : i32
    %c0_i32_1 = arith.constant 0 : i32
    return %c0_i32, %c0_i32_0 : i32, i32
  }
  func.func @transform_5(%arg0: i32) -> (i32, i32) {
    %c0_i32 = arith.constant 0 : i32
    %c0_i32_0 = arith.constant 0 : i32
    %c0_i32_1 = arith.constant 0 : i32
    return %c0_i32, %c0_i32_0 : i32, i32
  }
  func.func @transform_6(%arg0: i32) -> (i32, i32) {
    %c0_i32 = arith.constant 0 : i32
    %c0_i32_0 = arith.constant 0 : i32
    %c0_i32_1 = arith.constant 0 : i32
    return %c0_i32, %c0_i32_0 : i32, i32
  }
  func.func @transform_7(%arg0: i32) -> (i32, i32) {
    %c0_i32 = arith.constant 0 : i32
    %c0_i32_0 = arith.constant 0 : i32
    return %arg0, %c0_i32 : i32, i32
  }
}

</mosaic_0001>

<bundles_post_ra>
// kernel: raynet2_forward.1
= control target key start
LH: loop header
LB: loop body
LE: loop exit
PB: predicated region body
PF: predicated region fallthrough
CT: control target
= control target key end

     0   :  { %s5073_s1 = inlined_call_operand.vmem [shape: bf16[256,512], index: 1, kind: input, shape index: {}]   ;;  %s5074_s0 = inlined_call_operand.vmem [shape: f32[8,256], index: 0, kind: input, shape index: {}]   ;;  %s5075_s3 = inlined_call_operand.vmem [shape: bf16[512,1024], index: 3, kind: input, shape index: {}]   ;;  %s5076_s2 = inlined_call_operand.vmem [shape: f32[1,512], index: 2, kind: input, shape index: {}]   ;;  %s5077_s5 = inlined_call_operand.vmem [shape: bf16[1024,128], index: 5, kind: input, shape index: {}]   ;;  %s5078_s4 = inlined_call_operand.vmem [shape: f32[1,1024], index: 4, kind: input, shape index: {}]   ;;  %s5079_s6 = inlined_call_operand.vmem [shape: f32[1,128], index: 6, kind: input, shape index: {}]   ;;  %s5080_s7 = inlined_call_operand.vmem [shape: f32[8,128], index: 7, kind: output, shape index: {}]  }
   0x1   :  { %v3630_v0 = vld [vmem:[%s5073_s1 + $0x4] ss:$16 sps:$4 sm:$0xff]   ;;  %v3632_v1 = vld [vmem:[%s5073_s1] ss:$16 sps:$4 sm:$0xff]   ;;  %v3678_v14 = vld [vmem:[%s5073_s1 + $0xc] ss:$16 sps:$4 sm:$0xff]  }
   0x2   :  { %437 = vmatprep.subr.bf16.mxu0 %v3630_v0  ;;  %v3633_v2 = vld [vmem:[%s5073_s1 + $0x24] ss:$16 sps:$4 sm:$0xff]   ;;  %v3635_v3 = vld [vmem:[%s5073_s1 + $0x20] ss:$16 sps:$4 sm:$0xff]   ;;  %v3680_v15 = vld [vmem:[%s5073_s1 + $0x8] ss:$16 sps:$4 sm:$0xff]   ;;  %478 = vmatprep.subr.bf16.mxu1 %v3678_v14 }
   0x3   :  { %438 = vmatpush1.bf16.msra.mxu0 %v3632_v1  ;;  %v3636_v4 = vld [vmem:[%s5073_s1 + $0x44] ss:$16 sps:$4 sm:$0xff]   ;;  %v3638_v5 = vld [vmem:[%s5073_s1 + $0x40] ss:$16 sps:$4 sm:$0xff]   ;;  %v28_v16 = vld [vmem:[%s5074_s0 + $0x8] sm:$0xff]  ;;  %479 = vmatpush1.bf16.msra.mxu1 %v3680_v15 }
   0x4   :  { %439 = vmatprep.subr.bf16.mxu0 %v3633_v2  ;;  %v3639_v6 = vld [vmem:[%s5073_s1 + $0x64] ss:$16 sps:$4 sm:$0xff]   ;;  %v3641_v7 = vld [vmem:[%s5073_s1 + $0x60] ss:$16 sps:$4 sm:$0xff]   ;;  %v30_v18 = vpack.c.bf16 %v28_v16, %v28_v16  ;;  %v3681_v19 = vld [vmem:[%s5073_s1 + $0x2c] ss:$16 sps:$4 sm:$0xff]  }
   0x5   :  { %v3642_v8 = vld [vmem:[%s5073_s1 + $0x84] ss:$16 sps:$4 sm:$0xff]   ;;  %v3644_v9 = vld [vmem:[%s5073_s1 + $0x80] ss:$16 sps:$4 sm:$0xff]   ;;  %v3683_v20 = vld [vmem:[%s5073_s1 + $0x28] ss:$16 sps:$4 sm:$0xff]   ;;  %480 = vmatprep.subr.bf16.mxu1 %v3681_v19 }
   0x6   :  { %v3645_v10 = vld [vmem:[%s5073_s1 + $0xa4] ss:$16 sps:$4 sm:$0xff]   ;;  %v3647_v11 = vld [vmem:[%s5073_s1 + $0xa0] ss:$16 sps:$4 sm:$0xff]   ;;  %469 = vmatprep.mubr.bf16.mxu0 %v30_v18  ;;  %v3684_v21 = vld [vmem:[%s5073_s1 + $0x4c] ss:$16 sps:$4 sm:$0xff]   ;;  %510 = vmatprep.mubr.bf16.mxu1 %v30_v18 }
   0x7   :  { %440 = vmatpush1.bf16.msra.mxu0 %v3635_v3  ;;  %v3648_v12 = vld [vmem:[%s5073_s1 + $0xc4] ss:$16 sps:$4 sm:$0xff]   ;;  %v3650_v13 = vld [vmem:[%s5073_s1 + $0xc0] ss:$16 sps:$4 sm:$0xff]   ;;  %481 = vmatpush1.bf16.msra.mxu1 %v3683_v20  ;;  %v3686_v24 = vld [vmem:[%s5073_s1 + $0x48] ss:$16 sps:$4 sm:$0xff]  }
   0x8   :  { %441 = vmatprep.subr.bf16.mxu0 %v3636_v4  ;;  %v3651_v17 = vld [vmem:[%s5073_s1 + $0xe4] ss:$16 sps:$4 sm:$0xff]   ;;  %v3653_v22 = vld [vmem:[%s5073_s1 + $0xe0] ss:$16 sps:$4 sm:$0xff]   ;;  %482 = vmatprep.subr.bf16.mxu1 %v3684_v21  ;;  %v3687_v25 = vld [vmem:[%s5073_s1 + $0x6c] ss:$16 sps:$4 sm:$0xff]  }
   0x9   :  { %v3654_v23 = vld [vmem:[%s5073_s1 + $0x104] ss:$16 sps:$4 sm:$0xff]   ;;  %v3656_v26 = vld [vmem:[%s5073_s1 + $0x100] ss:$16 sps:$4 sm:$0xff]   ;;  %v3689_v28 = vld [vmem:[%s5073_s1 + $0x68] ss:$16 sps:$4 sm:$0xff]  }
   0xa   :  { %v3657_v27 = vld [vmem:[%s5073_s1 + $0x124] ss:$16 sps:$4 sm:$0xff]   ;;  %v3690_v29 = vld [vmem:[%s5073_s1 + $0x8c] ss:$16 sps:$4 sm:$0xff]   ;;  %v3659_v30 = vld [vmem:[%s5073_s1 + $0x120] ss:$16 sps:$4 sm:$0xff]  }
   0xb   :  { %442 = vmatpush1.bf16.msra.mxu0 %v3638_v5  ;;  %483 = vmatpush1.bf16.msra.mxu1 %v3686_v24  ;;  %v3660_v31 = vld [vmem:[%s5073_s1 + $0x144] ss:$16 sps:$4 sm:$0xff]   ;;  %v3692_v32 = vld [vmem:[%s5073_s1 + $0x88] ss:$16 sps:$4 sm:$0xff]   ;;  %v3693_v33 = vld [vmem:[%s5073_s1 + $0xac] ss:$16 sps:$4 sm:$0xff]  }
   0xc   :  { %443 = vmatprep.subr.bf16.mxu0 %v3639_v6  ;;  %484 = vmatprep.subr.bf16.mxu1 %v3687_v25  ;;  %v3662_v34 = vld [vmem:[%s5073_s1 + $0x140] ss:$16 sps:$4 sm:$0xff]   ;;  %v3663_v35 = vld [vmem:[%s5073_s1 + $0x164] ss:$16 sps:$4 sm:$0xff]   ;;  %v3695_v36 = vld [vmem:[%s5073_s1 + $0xa8] ss:$16 sps:$4 sm:$0xff]  }
   0xd   :  { %v3696_v37 = vld [vmem:[%s5073_s1 + $0xcc] ss:$16 sps:$4 sm:$0xff]   ;;  %v3665_v38 = vld [vmem:[%s5073_s1 + $0x160] ss:$16 sps:$4 sm:$0xff]   ;;  %v3666_v39 = vld [vmem:[%s5073_s1 + $0x184] ss:$16 sps:$4 sm:$0xff]  }
   0xe   :  { %v3698_v40 = vld [vmem:[%s5073_s1 + $0xc8] ss:$16 sps:$4 sm:$0xff]   ;;  %v3699_v41 = vld [vmem:[%s5073_s1 + $0xec] ss:$16 sps:$4 sm:$0xff]   ;;  %v3668_v42 = vld [vmem:[%s5073_s1 + $0x180] ss:$16 sps:$4 sm:$0xff]  }
   0xf   :  { %444 = vmatpush1.bf16.msra.mxu0 %v3641_v7  ;;  %485 = vmatpush1.bf16.msra.mxu1 %v3689_v28  ;;  %v3669_v43 = vld [vmem:[%s5073_s1 + $0x1a4] ss:$16 sps:$4 sm:$0xff]   ;;  %v3701_v44 = vld [vmem:[%s5073_s1 + $0xe8] ss:$16 sps:$4 sm:$0xff]   ;;  %v3702_v45 = vld [vmem:[%s5073_s1 + $0x10c] ss:$16 sps:$4 sm:$0xff]  }
  0x10   :  { %445 = vmatprep.subr.bf16.mxu0 %v3642_v8  ;;  %486 = vmatprep.subr.bf16.mxu1 %v3690_v29  ;;  %v3671_v46 = vld [vmem:[%s5073_s1 + $0x1a0] ss:$16 sps:$4 sm:$0xff]   ;;  %v3672_v47 = vld [vmem:[%s5073_s1 + $0x1c4] ss:$16 sps:$4 sm:$0xff]   ;;  %v3704_v48 = vld [vmem:[%s5073_s1 + $0x108] ss:$16 sps:$4 sm:$0xff]  }
  0x11   :  { %v3705_v49 = vld [vmem:[%s5073_s1 + $0x12c] ss:$16 sps:$4 sm:$0xff]   ;;  %v3674_v50 = vld [vmem:[%s5073_s1 + $0x1c0] ss:$16 sps:$4 sm:$0xff]   ;;  %v3675_v51 = vld [vmem:[%s5073_s1 + $0x1e4] ss:$16 sps:$4 sm:$0xff]  }
  0x12   :  { %v3707_v52 = vld [vmem:[%s5073_s1 + $0x128] ss:$16 sps:$4 sm:$0xff]   ;;  %v527_v53 = vld [vmem:[%s5075_s3] sm:$0xff]  ;;  %v3708_v55 = vld [vmem:[%s5073_s1 + $0x14c] ss:$16 sps:$4 sm:$0xff]  }
  0x13   :  { %446 = vmatpush1.bf16.msra.mxu0 %v3644_v9  ;;  %487 = vmatpush1.bf16.msra.mxu1 %v3692_v32  ;;  %v531_v54 = vld [vmem:[%s5075_s3 + $0x20] sm:$0xff]  ;;  %v3710_v59 = vld [vmem:[%s5073_s1 + $0x148] ss:$16 sps:$4 sm:$0xff]   ;;  %v3711_v63 = vld [vmem:[%s5073_s1 + $0x16c] ss:$16 sps:$4 sm:$0xff]  }
  0x14   :  { %447 = vmatprep.subr.bf16.mxu0 %v3645_v10  ;;  %488 = vmatprep.subr.bf16.mxu1 %v3693_v33  ;;  %v3677_v56 = vld [vmem:[%s5073_s1 + $0x1e0] ss:$16 sps:$4 sm:$0xff]   ;;  %v3198_v58 = vcombine.high %v527_v53, %v531_v54  ;;  %v3197_v0 = vcombine.low %v527_v53, %v531_v54  ;;  %v3713_v2 = vld [vmem:[%s5073_s1 + $0x168] ss:$16 sps:$4 sm:$0xff]   ;;  %v3714_v5 = vld [vmem:[%s5073_s1 + $0x18c] ss:$16 sps:$4 sm:$0xff]  }
  0x15   :  { %v27_v57 = vld [vmem:[%s5074_s0] sm:$0xff]  ;;  %v3716_v8 = vld [vmem:[%s5073_s1 + $0x188] ss:$16 sps:$4 sm:$0xff]  }
  0x16   :  { %v535_v60 = vld [vmem:[%s5075_s3 + $0x40] sm:$0xff]  ;;  %v4010_v62 = vpack.c.bf16 %v27_v57, %v27_v57  ;;  %v3719_v14 = vld [vmem:[%s5073_s1 + $0x1a8] ss:$16 sps:$4 sm:$0xff]  }
  0x17   :  { %448 = vmatpush1.bf16.msra.mxu0 %v3647_v11  ;;  %489 = vmatpush1.bf16.msra.mxu1 %v3695_v36  ;;  %v539_v61 = vld [vmem:[%s5075_s3 + $0x60] sm:$0xff]  ;;  %v3717_v11 = vld [vmem:[%s5073_s1 + $0x1ac] ss:$16 sps:$4 sm:$0xff]   ;;  %v3722_v20 = vld [vmem:[%s5073_s1 + $0x1c8] ss:$16 sps:$4 sm:$0xff]  }
  0x18   :  { %449 = vmatprep.subr.bf16.mxu0 %v3648_v12  ;;  %490 = vmatprep.subr.bf16.mxu1 %v3696_v37  ;;  %v3206_v1 = vcombine.high %v535_v60, %v539_v61  ;;  %v543_v3 = vld [vmem:[%s5075_s3 + $0x80] sm:$0xff]  ;;  %v3205_v6 = vcombine.low %v535_v60, %v539_v61  ;;  %v528_v24 = vld [vmem:[%s5075_s3 + $0x8] sm:$0xff] }
  0x19   :  { %v547_v4 = vld [vmem:[%s5075_s3 + $0xa0] sm:$0xff]  ;;  %v532_v25 = vld [vmem:[%s5075_s3 + $0x28] sm:$0xff] }
  0x1a   :  { %v3214_v7 = vcombine.high %v543_v3, %v547_v4  ;;  %v551_v9 = vld [vmem:[%s5075_s3 + $0xc0] sm:$0xff]  ;;  %v3213_v12 = vcombine.low %v543_v3, %v547_v4  ;;  %v3725_v28 = vld [vmem:[%s5073_s1 + $0x1e8] ss:$16 sps:$4 sm:$0xff]   ;;  %v3199_v36 = vcombine.low %v528_v24, %v532_v25 }
  0x1b   :  { %450 = vmatpush1.bf16.msra.mxu0 %v3650_v13  ;;  %491 = vmatpush1.bf16.msra.mxu1 %v3698_v40  ;;  %v555_v10 = vld [vmem:[%s5075_s3 + $0xe0] sm:$0xff]  ;;  %v536_v32 = vld [vmem:[%s5075_s3 + $0x48] sm:$0xff] }
  0x1c   :  { %451 = vmatprep.subr.bf16.mxu0 %v3651_v17  ;;  %492 = vmatprep.subr.bf16.mxu1 %v3699_v41  ;;  %v3222_v13 = vcombine.high %v551_v9, %v555_v10  ;;  %v559_v15 = vld [vmem:[%s5075_s3 + $0x100] sm:$0xff]  ;;  %v3720_v17 = vld [vmem:[%s5073_s1 + $0x1cc] ss:$16 sps:$4 sm:$0xff]   ;;  %v3221_v18 = vcombine.low %v551_v9, %v555_v10 }
  0x1d   :  { %v563_v16 = vld [vmem:[%s5075_s3 + $0x120] sm:$0xff]  ;;  %v540_v33 = vld [vmem:[%s5075_s3 + $0x68] sm:$0xff] }
  0x1e   :  { %v3230_v19 = vcombine.high %v559_v15, %v563_v16  ;;  %v567_v21 = vld [vmem:[%s5075_s3 + $0x140] sm:$0xff]  ;;  %v544_v40 = vld [vmem:[%s5075_s3 + $0x88] sm:$0xff] }
  0x1f   :  { %452 = vmatpush1.bf16.msra.mxu0 %v3653_v22  ;;  %493 = vmatpush1.bf16.msra.mxu1 %v3701_v44  ;;  %v571_v22 = vld [vmem:[%s5075_s3 + $0x160] sm:$0xff]  ;;  %v548_v41 = vld [vmem:[%s5075_s3 + $0xa8] sm:$0xff]  ;;  %v3207_v44 = vcombine.low %v536_v32, %v540_v33 }
  0x20   :  { %453 = vmatprep.subr.bf16.mxu0 %v3654_v23  ;;  %494 = vmatprep.subr.bf16.mxu1 %v3702_v45  ;;  %v3723_v23 = vld [vmem:[%s5073_s1 + $0x1ec] ss:$16 sps:$4 sm:$0xff]   ;;  %v575_v29 = vld [vmem:[%s5075_s3 + $0x180] sm:$0xff] }
  0x21   :  { %v583_v37 = vld [vmem:[%s5075_s3 + $0x1c0] sm:$0xff]  ;;  %v564_v57 = vld [vmem:[%s5075_s3 + $0x128] sm:$0xff] }
  0x22   :  { %v591_v45 = vld [vmem:[%s5075_s3 + $0x200] sm:$0xff]  ;;  %v580_v9 = vld [vmem:[%s5075_s3 + $0x1a8] sm:$0xff] }
  0x23   :  { %454 = vmatpush1.bf16.msra.mxu0 %v3656_v26  ;;  %495 = vmatpush1.bf16.msra.mxu1 %v3704_v48  ;;  %v3229_v26 = vcombine.low %v559_v15, %v563_v16  ;;  %v552_v48 = vld [vmem:[%s5075_s3 + $0xc8] sm:$0xff]  ;;  %v599_v53 = vld [vmem:[%s5075_s3 + $0x240] sm:$0xff] }
  0x24   :  { %455 = vmatprep.subr.bf16.mxu0 %v3657_v27  ;;  %496 = vmatprep.subr.bf16.mxu1 %v3705_v49  ;;  %v3238_v27 = vcombine.high %v567_v21, %v571_v22  ;;  %v556_v49 = vld [vmem:[%s5075_s3 + $0xe8] sm:$0xff]  ;;  %v603_v54 = vld [vmem:[%s5075_s3 + $0x260] sm:$0xff] }
  0x25   :  { %v3223_v60 = vcombine.low %v552_v48, %v556_v49  ;;  %v607_v61 = vld [vmem:[%s5075_s3 + $0x280] sm:$0xff]  ;;  %v584_v16 = vld [vmem:[%s5075_s3 + $0x1c8] sm:$0xff] }
  0x27   :  { %456 = vmatpush1.bf16.msra.mxu0 %v3659_v30  ;;  %497 = vmatpush1.bf16.msra.mxu1 %v3707_v52  ;;  %v579_v30 = vld [vmem:[%s5075_s3 + $0x1a0] sm:$0xff]  ;;  %v3215_v52 = vcombine.low %v544_v40, %v548_v41 }
  0x28   :  { %457 = vmatprep.subr.bf16.mxu0 %v3660_v31  ;;  %498 = vmatprep.subr.bf16.mxu1 %v3708_v55  ;;  %v3200_v31 = vcombine.high %v528_v24, %v532_v25  ;;  %v3224_v55 = vcombine.high %v552_v48, %v556_v49  ;;  %v592_v24 = vld [vmem:[%s5075_s3 + $0x208] sm:$0xff] }
  0x29   :  { %v596_v25 = vld [vmem:[%s5075_s3 + $0x228] sm:$0xff] }
  0x2a   :  { %v636_v48 = vld [vmem:[%s5075_s3 + $0x368] sm:$0xff] }
  0x2b   :  { %458 = vmatpush1.bf16.msra.mxu0 %v3662_v34  ;;  %499 = vmatpush1.bf16.msra.mxu1 %v3710_v59  ;;  %v3237_v34 = vcombine.low %v567_v21, %v571_v22  ;;  %v3270_v59 = vcombine.high %v599_v53, %v603_v54  ;;  %v631_v21 = vld [vmem:[%s5075_s3 + $0x340] sm:$0xff] }
  0x2c   :  { %459 = vmatprep.subr.bf16.mxu0 %v3663_v35  ;;  %500 = vmatprep.subr.bf16.mxu1 %v3711_v63  ;;  %v3246_v35 = vcombine.high %v575_v29, %v579_v30  ;;  %v635_v22 = vld [vmem:[%s5075_s3 + $0x360] sm:$0xff] }
  0x2f   :  { %460 = vmatpush1.bf16.msra.mxu0 %v3665_v38  ;;  %501 = vmatpush1.bf16.msra.mxu1 %v3713_v2  ;;  %v587_v38 = vld [vmem:[%s5075_s3 + $0x1e0] sm:$0xff]  ;;  %v3269_v2 = vcombine.low %v599_v53, %v603_v54  ;;  %v640_v54 = vld [vmem:[%s5075_s3 + $0x388] sm:$0xff] }
  0x30   :  { %461 = vmatprep.subr.bf16.mxu0 %v3666_v39  ;;  %502 = vmatprep.subr.bf16.mxu1 %v3714_v5  ;;  %v3208_v39 = vcombine.high %v536_v32, %v540_v33  ;;  %v615_v5 = vld [vmem:[%s5075_s3 + $0x2c0] sm:$0xff]  ;;  %v3301_v32 = vcombine.low %v631_v21, %v635_v22  ;;  %v3263_v33 = vcombine.low %v592_v24, %v596_v25 }
  0x31   :  { %v643_v53 = vld [vmem:[%s5075_s3 + $0x3a0] sm:$0xff] }
  0x33   :  { %462 = vmatpush1.bf16.msra.mxu0 %v3668_v42  ;;  %503 = vmatpush1.bf16.msra.mxu1 %v3716_v8  ;;  %v3245_v42 = vcombine.low %v575_v29, %v579_v30  ;;  %v576_v8 = vld [vmem:[%s5075_s3 + $0x188] sm:$0xff]  ;;  %v3264_v29 = vcombine.high %v592_v24, %v596_v25 }
  0x34   :  { %463 = vmatprep.subr.bf16.mxu0 %v3669_v43  ;;  %504 = vmatprep.subr.bf16.mxu1 %v3717_v11  ;;  %v3254_v43 = vcombine.high %v583_v37, %v587_v38  ;;  %v3248_v15 = vcombine.high %v576_v8, %v580_v9  ;;  %v600_v30 = vld [vmem:[%s5075_s3 + $0x248] sm:$0xff] }
  0x37   :  { %464 = vmatpush1.bf16.msra.mxu0 %v3671_v46  ;;  %505 = vmatpush1.bf16.msra.mxu1 %v3719_v14  ;;  %v595_v46 = vld [vmem:[%s5075_s3 + $0x220] sm:$0xff] }
  0x38   :  { %465 = vmatprep.subr.bf16.mxu0 %v3672_v47  ;;  %506 = vmatprep.subr.bf16.mxu1 %v3720_v17  ;;  %v3216_v47 = vcombine.high %v544_v40, %v548_v41  ;;  %v627_v14 = vld [vmem:[%s5075_s3 + $0x320] sm:$0xff]  ;;  %v588_v17 = vld [vmem:[%s5075_s3 + $0x1e8] sm:$0xff] }
  0x39   :  { %v620_v40 = vld [vmem:[%s5075_s3 + $0x2e8] sm:$0xff] }
  0x3b   :  { %466 = vmatpush1.bf16.msra.mxu0 %v3674_v50  ;;  %507 = vmatpush1.bf16.msra.mxu1 %v3722_v20  ;;  %v3253_v50 = vcombine.low %v583_v37, %v587_v38  ;;  %v3247_v20 = vcombine.low %v576_v8, %v580_v9  ;;  %v660_v8 = vld [vmem:[%s5075_s3 + $0x428] sm:$0xff] }
  0x3c   :  { %467 = vmatprep.subr.bf16.mxu0 %v3675_v51  ;;  %508 = vmatprep.subr.bf16.mxu1 %v3723_v23  ;;  %v3262_v51 = vcombine.high %v591_v45, %v595_v46  ;;  %v3256_v23 = vcombine.high %v584_v16, %v588_v17 }
  0x3f   :  { %468 = vmatpush1.bf16.msra.mxu0 %v3677_v56  ;;  %509 = vmatpush1.bf16.msra.mxu1 %v3725_v28  ;;  %v560_v56 = vld [vmem:[%s5075_s3 + $0x108] sm:$0xff]  ;;  %v3255_v28 = vcombine.low %v584_v16, %v588_v17 }
  0x40   :  { %2105 = vmatprep.subr.bf16.mxu0 %v3198_v58  ;;  %2187 = vmatprep.subr.bf16.mxu1 %v3200_v31  ;;  %v3261_v58 = vcombine.low %v591_v45, %v595_v46  ;;  %v3232_v63 = vcombine.high %v560_v56, %v564_v57  ;;  %v3231_v4 = vcombine.low %v560_v56, %v564_v57  ;;  %v604_v31 = vld [vmem:[%s5075_s3 + $0x268] sm:$0xff] }
  0x41   :  { %v3271_v37 = vcombine.low %v600_v30, %v604_v31  ;;  %v644_v56 = vld [vmem:[%s5075_s3 + $0x3a8] sm:$0xff] }
  0x42   :  { %470 = vmatmul.mubr.bf16.vlgmr.msra.gmra.mrb[0].mxu0 %v4010_v62  ;;  %511 = vmatmul.mubr.bf16.vlgmr.msra.gmra.mrb[0].mxu1 %v4010_v62  ;;  %v611_v62 = vld [vmem:[%s5075_s3 + $0x2a0] sm:$0xff] }
  0x43   :  { %2106 = vmatpush1.bf16.msra.mxu0 %v3197_v0  ;;  %2188 = vmatpush1.bf16.msra.mxu1 %v3199_v36  ;;  %v568_v0 = vld [vmem:[%s5075_s3 + $0x148] sm:$0xff]  ;;  %v3278_v3 = vcombine.high %v607_v61, %v611_v62  ;;  %v3277_v10 = vcombine.low %v607_v61, %v611_v62  ;;  %v651_v61 = vld [vmem:[%s5075_s3 + $0x3e0] sm:$0xff] }
  0x44   :  { %2107 = vmatprep.subr.bf16.mxu0 %v3206_v1  ;;  %2189 = vmatprep.subr.bf16.mxu1 %v3208_v39  ;;  %v572_v1 = vld [vmem:[%s5075_s3 + $0x168] sm:$0xff] }
  0x45   :  { %v612_v36 = vld [vmem:[%s5075_s3 + $0x2a8] sm:$0xff] }
  0x46   :  { %v616_v39 = vld [vmem:[%s5075_s3 + $0x2c8] sm:$0xff] }
  0x47   :  { %2108 = vmatpush1.bf16.msra.mxu0 %v3205_v6  ;;  %2190 = vmatpush1.bf16.msra.mxu1 %v3207_v44  ;;  %v619_v6 = vld [vmem:[%s5075_s3 + $0x2e0] sm:$0xff]  ;;  %v628_v44 = vld [vmem:[%s5075_s3 + $0x328] sm:$0xff]  ;;  %v3287_v45 = vcombine.low %v616_v39, %v620_v40 }
  0x48   :  { %2109 = vmatprep.subr.bf16.mxu0 %v3214_v7  ;;  %2191 = vmatprep.subr.bf16.mxu1 %v3216_v47  ;;  %v3240_v7 = vcombine.high %v568_v0, %v572_v1  ;;  %v3286_v11 = vcombine.high %v615_v5, %v619_v6  ;;  %v632_v47 = vld [vmem:[%s5075_s3 + $0x348] sm:$0xff] }
  0x49   :  { %v648_v62 = vld [vmem:[%s5075_s3 + $0x3c8] sm:$0xff] }
  0x4b   :  { %2110 = vmatpush1.bf16.msra.mxu0 %v3213_v12  ;;  %2192 = vmatpush1.bf16.msra.mxu1 %v3215_v52  ;;  %v3239_v12 = vcombine.low %v568_v0, %v572_v1  ;;  %v639_v52 = vld [vmem:[%s5075_s3 + $0x380] sm:$0xff]  ;;  %v652_v0 = vld [vmem:[%s5075_s3 + $0x3e8] sm:$0xff] }
  0x4c   :  { %2111 = vmatprep.subr.bf16.mxu0 %v3222_v13  ;;  %2193 = vmatprep.subr.bf16.mxu1 %v3224_v55  ;;  %v623_v13 = vld [vmem:[%s5075_s3 + $0x300] sm:$0xff]  ;;  %v3310_v55 = vcombine.high %v639_v52, %v643_v53  ;;  %v3309_v57 = vcombine.low %v639_v52, %v643_v53  ;;  %v688_v53 = vld [vmem:[%s5075_s3 + $0x508] sm:$0xff] }
  0x4d   :  { %v691_v52 = vld [vmem:[%s5075_s3 + $0x520] sm:$0xff] }
  0x4f   :  { %2112 = vmatpush1.bf16.msra.mxu0 %v3221_v18  ;;  %2194 = vmatpush1.bf16.msra.mxu1 %v3223_v60  ;;  %v3285_v18 = vcombine.low %v615_v5, %v619_v6  ;;  %v647_v60 = vld [vmem:[%s5075_s3 + $0x3c0] sm:$0xff]  ;;  %v656_v6 = vld [vmem:[%s5075_s3 + $0x408] sm:$0xff] }
  0x50   :  { %2113 = vmatprep.subr.bf16.mxu0 %v3230_v19  ;;  %2195 = vmatprep.subr.bf16.mxu1 %v3232_v63  ;;  %v3294_v19 = vcombine.high %v623_v13, %v627_v14  ;;  %v3318_v63 = vcombine.high %v647_v60, %v651_v61  ;;  %v3317_v1 = vcombine.low %v647_v60, %v651_v61  ;;  %v659_v5 = vld [vmem:[%s5075_s3 + $0x420] sm:$0xff] }
  0x51   :  { %v695_v60 = vld [vmem:[%s5075_s3 + $0x540] sm:$0xff] }
  0x52   :  { %v699_v61 = vld [vmem:[%s5075_s3 + $0x560] sm:$0xff] }
  0x53   :  { %2114 = vmatpush1.bf16.msra.mxu0 %v3229_v26  ;;  %2196 = vmatpush1.bf16.msra.mxu1 %v3231_v4  ;;  %v3293_v26 = vcombine.low %v623_v13, %v627_v14  ;;  %v655_v4 = vld [vmem:[%s5075_s3 + $0x400] sm:$0xff] }
  0x54   :  { %2115 = vmatprep.subr.bf16.mxu0 %v3238_v27  ;;  %2197 = vmatprep.subr.bf16.mxu1 %v3240_v7  ;;  %v3302_v27 = vcombine.high %v631_v21, %v635_v22  ;;  %v3326_v7 = vcombine.high %v655_v4, %v659_v5  ;;  %v3325_v9 = vcombine.low %v655_v4, %v659_v5 }
  0x55   :  { %v3366_v4 = vcombine.high %v695_v60, %v699_v61 }
  0x57   :  { %2116 = vmatpush1.bf16.msra.mxu0 %v3237_v34  ;;  %2198 = vmatpush1.bf16.msra.mxu1 %v3239_v12  ;;  %v3272_v34 = vcombine.high %v600_v30, %v604_v31  ;;  %v97_v12 = vlaneseq  ;;  %v668_v30 = vld [vmem:[%s5075_s3 + $0x468] sm:$0xff] }
  0x58   :  { %2117 = vmatprep.subr.bf16.mxu0 %v3246_v35  ;;  %2199 = vmatprep.subr.bf16.mxu1 %v3248_v15  ;;  %v608_v35 = vld [vmem:[%s5075_s3 + $0x288] sm:$0xff]  ;;  %v4242_v15 = vld [vmem:[%s5076_s2] sm:$0xf] }
  0x59   :  { %v3280_v38 = vcombine.high %v608_v35, %v612_v36  ;;  %v3279_v41 = vcombine.low %v608_v35, %v612_v36  ;;  %v4236_v13 = vshrl.u32 %v97_v12, 7  ;;  %v671_v35 = vld [vmem:[%s5075_s3 + $0x480] sm:$0xff] }
  0x5a   :  { %v675_v36 = vld [vmem:[%s5075_s3 + $0x4a0] sm:$0xff] }
  0x5b   :  { %2118 = vmatpush1.bf16.msra.mxu0 %v3245_v42  ;;  %2200 = vmatpush1.bf16.msra.mxu1 %v3247_v20  ;;  %v3288_v42 = vcombine.high %v616_v39, %v620_v40  ;;  %v99_v14 = vsub.s32 0, %v4236_v13  ;;  %v103_v16 = vsub.s32 1, %v4236_v13 }
  0x5c   :  { %2119 = vmatprep.subr.bf16.mxu0 %v3254_v43  ;;  %2201 = vmatprep.subr.bf16.mxu1 %v3256_v23  ;;  %v624_v43 = vld [vmem:[%s5075_s3 + $0x308] sm:$0xff] }
  0x5d   :  { %v3296_v46 = vcombine.high %v624_v43, %v628_v44  ;;  %v3295_v49 = vcombine.low %v624_v43, %v628_v44  ;;  %v100_v17 = vrot.slane %v4242_v15, %v99_v14  ;;  %v679_v43 = vld [vmem:[%s5075_s3 + $0x4c0] sm:$0xff] }
  0x5e   :  { %v683_v44 = vld [vmem:[%s5075_s3 + $0x4e0] sm:$0xff] }
  0x5f   :  { %2120 = vmatpush1.bf16.msra.mxu0 %v3253_v50  ;;  %2202 = vmatpush1.bf16.msra.mxu1 %v3255_v28  ;;  %v3304_v50 = vcombine.high %v632_v47, %v636_v48  ;;  %v667_v28 = vld [vmem:[%s5075_s3 + $0x460] sm:$0xff] }
  0x60   :  { %2121 = vmatprep.subr.bf16.mxu0 %v3262_v51  ;;  %2203 = vmatprep.subr.bf16.mxu1 %v3264_v29  ;;  %v3303_v51 = vcombine.low %v632_v47, %v636_v48  ;;  %v664_v29 = vld [vmem:[%s5075_s3 + $0x448] sm:$0xff]  ;;  %v3341_v47 = vcombine.low %v671_v35, %v675_v36 }
  0x61   :  { %v3335_v40 = vcombine.low %v664_v29, %v668_v30 }
  0x63   :  { %2122 = vmatpush1.bf16.msra.mxu0 %v3261_v58  ;;  %2204 = vmatpush1.bf16.msra.mxu1 %v3263_v33  ;;  %v3311_v58 = vcombine.low %v640_v54, %v644_v56 }
  0x64   :  { %2123 = vmatprep.subr.bf16.mxu0 %v3270_v59  ;;  %2205 = vmatprep.subr.bf16.mxu1 %v3272_v34  ;;  %v3312_v59 = vcombine.high %v640_v54, %v644_v56  ;;  %v3336_v34 = vcombine.high %v664_v29, %v668_v30  ;;  %v692_v54 = vld [vmem:[%s5075_s3 + $0x528] sm:$0xff]  ;;  %v3349_v56 = vcombine.low %v679_v43, %v683_v44 }
  0x67   :  { %2124 = vmatpush1.bf16.msra.mxu0 %v3269_v2  ;;  %2206 = vmatpush1.bf16.msra.mxu1 %v3271_v37  ;;  %v3319_v2 = vcombine.low %v648_v62, %v652_v0  ;;  %v672_v37 = vld [vmem:[%s5075_s3 + $0x488] sm:$0xff] }
  0x68   :  { %2125 = vmatprep.subr.bf16.mxu0 %v3278_v3  ;;  %2207 = vmatprep.subr.bf16.mxu1 %v3280_v38  ;;  %v3320_v3 = vcombine.high %v648_v62, %v652_v0  ;;  %v676_v38 = vld [vmem:[%s5075_s3 + $0x4a8] sm:$0xff] }
  0x69   :  { %v3343_v48 = vcombine.low %v672_v37, %v676_v38  ;;  %v696_v62 = vld [vmem:[%s5075_s3 + $0x548] sm:$0xff] }
  0x6b   :  { %2126 = vmatpush1.bf16.msra.mxu0 %v3277_v10  ;;  %2208 = vmatpush1.bf16.msra.mxu1 %v3279_v41  ;;  %v3327_v10 = vcombine.low %v656_v6, %v660_v8  ;;  %v3342_v41 = vcombine.high %v671_v35, %v675_v36  ;;  %v723_v35 = vld [vmem:[%s5075_s3 + $0x620] sm:$0xff]  ;;  %v720_v36 = vld [vmem:[%s5075_s3 + $0x608] sm:$0xff] }
  0x6c   :  { %2127 = vmatprep.subr.bf16.mxu0 %v3286_v11  ;;  %2209 = vmatprep.subr.bf16.mxu1 %v3288_v42  ;;  %v3328_v11 = vcombine.high %v656_v6, %v660_v8  ;;  %v3344_v42 = vcombine.high %v672_v37, %v676_v38  ;;  %v703_v6 = vld [vmem:[%s5075_s3 + $0x580] sm:$0xff]  ;;  %v724_v37 = vld [vmem:[%s5075_s3 + $0x628] sm:$0xff] }
  0x6d   :  { %v707_v8 = vld [vmem:[%s5075_s3 + $0x5a0] sm:$0xff] }
  0x6f   :  { %2128 = vmatpush1.bf16.msra.mxu0 %v3285_v18  ;;  %2210 = vmatpush1.bf16.msra.mxu1 %v3287_v45  ;;  %v104_v18 = vrot.slane %v4242_v15, %v103_v16  ;;  %v680_v45 = vld [vmem:[%s5075_s3 + $0x4c8] sm:$0xff] }
  0x70   :  { %2129 = vmatprep.subr.bf16.mxu0 %v3294_v19  ;;  %2211 = vmatprep.subr.bf16.mxu1 %v3296_v46  ;;  %v684_v46 = vld [vmem:[%s5075_s3 + $0x4e8] sm:$0xff] }
  0x73   :  { %2130 = vmatpush1.bf16.msra.mxu0 %v3293_v26  ;;  %2212 = vmatpush1.bf16.msra.mxu1 %v3295_v49  ;;  %v663_v26 = vld [vmem:[%s5075_s3 + $0x440] sm:$0xff]  ;;  %v3350_v49 = vcombine.high %v679_v43, %v683_v44  ;;  %v728_v44 = vld [vmem:[%s5075_s3 + $0x648] sm:$0xff] }
  0x74   :  { %2131 = vmatprep.subr.bf16.mxu0 %v3302_v27  ;;  %2213 = vmatprep.subr.bf16.mxu1 %v3304_v50  ;;  %v3334_v33 = vcombine.high %v663_v26, %v667_v28  ;;  %v3333_v39 = vcombine.low %v663_v26, %v667_v28  ;;  %v3352_v50 = vcombine.high %v680_v45, %v684_v46  ;;  %v716_v26 = vld [vmem:[%s5075_s3 + $0x5e8] sm:$0xff]  ;;  %v731_v43 = vld [vmem:[%s5075_s3 + $0x660] sm:$0xff] }
  0x75   :  { %v3373_v28 = vcombine.low %v703_v6, %v707_v8 }
  0x77   :  { %2132 = vmatpush1.bf16.msra.mxu0 %v3301_v32  ;;  %2214 = vmatpush1.bf16.msra.mxu1 %v3303_v51  ;;  %v687_v51 = vld [vmem:[%s5075_s3 + $0x500] sm:$0xff] }
  0x78   :  { %2133 = vmatprep.subr.bf16.mxu0 %v3310_v55  ;;  %2215 = vmatprep.subr.bf16.mxu1 %v3312_v59  ;;  %v111_v55 = vsub.s32 3, %v4236_v13  ;;  %v3360_v59 = vcombine.high %v688_v53, %v692_v54 }
  0x7a   :  { %v112_v0 = vrot.slane %v4242_v15, %v111_v55 }
  0x7b   :  { %2134 = vmatpush1.bf16.msra.mxu0 %v3309_v57  ;;  %2216 = vmatpush1.bf16.msra.mxu1 %v3311_v58  ;;  %v3351_v57 = vcombine.low %v680_v45, %v684_v46  ;;  %v3358_v58 = vcombine.high %v687_v51, %v691_v52  ;;  %v732_v45 = vld [vmem:[%s5075_s3 + $0x668] sm:$0xff] }
  0x7c   :  { %2135 = vmatprep.subr.bf16.mxu0 %v3318_v63  ;;  %2217 = vmatprep.subr.bf16.mxu1 %v3320_v3  ;;  %v700_v63 = vld [vmem:[%s5075_s3 + $0x568] sm:$0xff] }
  0x7d   :  { %v3368_v5 = vcombine.high %v696_v62, %v700_v63 }
  0x7f   :  { %2136 = vmatpush1.bf16.msra.mxu0 %v3317_v1  ;;  %2218 = vmatpush1.bf16.msra.mxu1 %v3319_v2  ;;  %v3357_v1 = vcombine.low %v687_v51, %v691_v52  ;;  %v3359_v2 = vcombine.low %v688_v53, %v692_v54  ;;  %v739_v51 = vld [vmem:[%s5075_s3 + $0x6a0] sm:$0xff]  ;;  %v736_v52 = vld [vmem:[%s5075_s3 + $0x688] sm:$0xff] }
  0x80   :  { %2146 = vmatprep.subr.bf16.mxu0 %v3326_v7  ;;  %2228 = vmatprep.subr.bf16.mxu1 %v3328_v11  ;;  %v740_v53 = vld [vmem:[%s5075_s3 + $0x6a8] sm:$0xff] }
 0x115   :  { %v471_v19 = vpop.f32.mrb[0].mxu0  ;;  %v4323_v3 = vpop.f32.mrb[0].mxu1 }
 0x116   :  { %v472_v20 = vadd.f32 %v471_v19, %v100_v17  ;;  %v473_v21 = vpop.f32.mrb[1].mxu0  ;;  %v514_v7 = vpop.f32.mrb[1].mxu1  ;;  %v3367_v19 = vcombine.low %v696_v62, %v700_v63  ;;  %v748_v62 = vld [vmem:[%s5075_s3 + $0x6e8] sm:$0xff] }
 0x117   :  { %v474_v22 = vadd.f32 %v473_v21, %v104_v18  ;;  %v475_v23 = vpop.f32.mrb[2].mxu0  ;;  %v515_v11 = vadd.f32 %v514_v7, %v112_v0  ;;  %v516_v12 = vpop.f32.mrb[2].mxu1  ;;  %v3365_v18 = vcombine.low %v695_v60, %v699_v61  ;;  %v3374_v21 = vcombine.high %v703_v6, %v707_v8  ;;  %v747_v60 = vld [vmem:[%s5075_s3 + $0x6e0] sm:$0xff]  ;;  %v744_v61 = vld [vmem:[%s5075_s3 + $0x6c8] sm:$0xff] }
 0x118   :  { %v519_v24 = vmax.f32 %v472_v20, 0.0  ;;  %v476_v25 = vpop.f32.mrb[3].mxu0  ;;  %v517_v17 = vpop.f32.mrb[3].mxu1  ;;  %v711_v23 = vld [vmem:[%s5075_s3 + $0x5c0] sm:$0xff]  ;;  %v3407_v0 = vcombine.low %v736_v52, %v740_v53  ;;  %v752_v6 = vld [vmem:[%s5075_s3 + $0x708] sm:$0xff] }
 0x119   :  { %v520_v27 = vmax.f32 %v474_v22, 0.0  ;;  %v522_v20 = vmax.f32 %v515_v11, 0.0  ;;  %v712_v25 = vld [vmem:[%s5075_s3 + $0x5c8] sm:$0xff]  ;;  %v759_v12 = vld [vmem:[%s5075_s3 + $0x740] sm:$0xff] }
 0x11a   :  { %v4265_v32 = vpack.c.bf16 %v519_v24, %v519_v24  ;;  %v715_v24 = vld [vmem:[%s5075_s3 + $0x5e0] sm:$0xff]  ;;  %v756_v7 = vld [vmem:[%s5075_s3 + $0x728] sm:$0xff] }
 0x11b   :  { %v4263_v31 = vpack.c.bf16 %v520_v27, %v520_v27  ;;  %v4349_v27 = vpack.c.bf16 %v522_v20, %v522_v20  ;;  %v3382_v30 = vcombine.high %v711_v23, %v715_v24  ;;  %v3381_v38 = vcombine.low %v711_v23, %v715_v24  ;;  %v763_v17 = vld [vmem:[%s5075_s3 + $0x760] sm:$0xff] }
 0x11c   :  { %v3424_v11 = vcombine.high %v752_v6, %v756_v7  ;;  %v107_v20 = vsub.s32 2, %v4236_v13  ;;  %v3430_v23 = vcombine.high %v759_v12, %v763_v17 }
 0x11d   :  { %2137 = vmatprep.mubr.bf16.mxu0 %v4263_v31  ;;  %2219 = vmatprep.mubr.bf16.mxu1 %v4263_v31 }
 0x11e   :  { %2138 = vmatmul.mubr.bf16.vlgmr.msra.gmra.mrb[4].mxu0 %v4265_v32  ;;  %2220 = vmatmul.mubr.bf16.vlgmr.msra.gmra.mrb[4].mxu1 %v4265_v32 }
 0x11f   :  { %2147 = vmatpush1.bf16.msra.mxu0 %v3325_v9  ;;  %2229 = vmatpush1.bf16.msra.mxu1 %v3327_v10  ;;  %v704_v9 = vld [vmem:[%s5075_s3 + $0x588] sm:$0xff] }
 0x120   :  { %2148 = vmatprep.subr.bf16.mxu0 %v3334_v33  ;;  %2230 = vmatprep.subr.bf16.mxu1 %v3336_v34  ;;  %v708_v10 = vld [vmem:[%s5075_s3 + $0x5a8] sm:$0xff]  ;;  %v3384_v33 = vcombine.high %v712_v25, %v716_v26  ;;  %v719_v34 = vld [vmem:[%s5075_s3 + $0x600] sm:$0xff] }
 0x121   :  { %v3376_v22 = vcombine.high %v704_v9, %v708_v10  ;;  %v3375_v29 = vcombine.low %v704_v9, %v708_v10  ;;  %2178 = vmatprep.mubr.bf16.mxu0 %v4349_v27  ;;  %2260 = vmatprep.mubr.bf16.mxu1 %v4349_v27  ;;  %v3389_v46 = vcombine.low %v719_v34, %v723_v35 }
 0x122   :  { %v3415_v9 = vcombine.low %v744_v61, %v748_v62 }
 0x123   :  { %2149 = vmatpush1.bf16.msra.mxu0 %v3333_v39  ;;  %2231 = vmatpush1.bf16.msra.mxu1 %v3335_v40  ;;  %v3383_v39 = vcombine.low %v712_v25, %v716_v26  ;;  %v3390_v40 = vcombine.high %v719_v34, %v723_v35  ;;  %v767_v25 = vld [vmem:[%s5075_s3 + $0x780] sm:$0xff] }
 0x124   :  { %2150 = vmatprep.subr.bf16.mxu0 %v3342_v41  ;;  %2232 = vmatprep.subr.bf16.mxu1 %v3344_v42  ;;  %v3392_v41 = vcombine.high %v720_v36, %v724_v37  ;;  %v727_v42 = vld [vmem:[%s5075_s3 + $0x640] sm:$0xff] }
 0x125   :  { %v3397_v54 = vcombine.low %v727_v42, %v731_v43  ;;  %v771_v26 = vld [vmem:[%s5075_s3 + $0x7a0] sm:$0xff] }
 0x126   :  { %v3438_v35 = vcombine.high %v767_v25, %v771_v26 }
 0x127   :  { %2151 = vmatpush1.bf16.msra.mxu0 %v3341_v47  ;;  %2233 = vmatpush1.bf16.msra.mxu1 %v3343_v48  ;;  %v3391_v47 = vcombine.low %v720_v36, %v724_v37  ;;  %v3398_v48 = vcombine.high %v727_v42, %v731_v43  ;;  %v775_v37 = vld [vmem:[%s5075_s3 + $0x7c0] sm:$0xff] }
 0x128   :  { %2152 = vmatprep.subr.bf16.mxu0 %v3350_v49  ;;  %2234 = vmatprep.subr.bf16.mxu1 %v3352_v50  ;;  %v3400_v49 = vcombine.high %v728_v44, %v732_v45  ;;  %v735_v50 = vld [vmem:[%s5075_s3 + $0x680] sm:$0xff] }
 0x129   :  { %v3405_v63 = vcombine.low %v735_v50, %v739_v51 }
 0x12b   :  { %2153 = vmatpush1.bf16.msra.mxu0 %v3349_v56  ;;  %2235 = vmatpush1.bf16.msra.mxu1 %v3351_v57  ;;  %v3399_v56 = vcombine.low %v728_v44, %v732_v45  ;;  %v3406_v57 = vcombine.high %v735_v50, %v739_v51  ;;  %v529_v45 = vld [vmem:[%s5075_s3 + $0x10] sm:$0xff] }
 0x12c   :  { %2154 = vmatprep.subr.bf16.mxu0 %v3358_v58  ;;  %2236 = vmatprep.subr.bf16.mxu1 %v3360_v59  ;;  %v3408_v58 = vcombine.high %v736_v52, %v740_v53  ;;  %v743_v59 = vld [vmem:[%s5075_s3 + $0x6c0] sm:$0xff]  ;;  %v537_v53 = vld [vmem:[%s5075_s3 + $0x50] sm:$0xff] }
 0x12d   :  { %v3413_v8 = vcombine.low %v743_v59, %v747_v60 }
 0x12f   :  { %2155 = vmatpush1.bf16.msra.mxu0 %v3357_v1  ;;  %2237 = vmatpush1.bf16.msra.mxu1 %v3359_v2  ;;  %v3414_v1 = vcombine.high %v743_v59, %v747_v60  ;;  %v3416_v2 = vcombine.high %v744_v61, %v748_v62 }
 0x130   :  { %2156 = vmatprep.subr.bf16.mxu0 %v3366_v4  ;;  %2238 = vmatprep.subr.bf16.mxu1 %v3368_v5  ;;  %v751_v4 = vld [vmem:[%s5075_s3 + $0x700] sm:$0xff] }
 0x131   :  { %v755_v5 = vld [vmem:[%s5075_s3 + $0x720] sm:$0xff] }
 0x132   :  { %v3422_v10 = vcombine.high %v751_v4, %v755_v5 }
 0x133   :  { %2157 = vmatpush1.bf16.msra.mxu0 %v3365_v18  ;;  %2239 = vmatpush1.bf16.msra.mxu1 %v3367_v19  ;;  %v760_v18 = vld [vmem:[%s5075_s3 + $0x748] sm:$0xff] }
 0x134   :  { %2158 = vmatprep.subr.bf16.mxu0 %v3374_v21  ;;  %2240 = vmatprep.subr.bf16.mxu1 %v3376_v22  ;;  %v764_v19 = vld [vmem:[%s5075_s3 + $0x768] sm:$0xff]  ;;  %v3421_v21 = vcombine.low %v751_v4, %v755_v5  ;;  %v3423_v22 = vcombine.low %v752_v6, %v756_v7  ;;  %v553_v5 = vld [vmem:[%s5075_s3 + $0xd0] sm:$0xff] }
 0x135   :  { %v3432_v24 = vcombine.high %v760_v18, %v764_v19  ;;  %v3431_v34 = vcombine.low %v760_v18, %v764_v19  ;;  %v565_v19 = vld [vmem:[%s5075_s3 + $0x130] sm:$0xff] }
 0x137   :  { %2159 = vmatpush1.bf16.msra.mxu0 %v3373_v28  ;;  %2241 = vmatpush1.bf16.msra.mxu1 %v3375_v29  ;;  %v768_v28 = vld [vmem:[%s5075_s3 + $0x788] sm:$0xff] }
 0x138   :  { %2160 = vmatprep.subr.bf16.mxu0 %v3382_v30  ;;  %2242 = vmatprep.subr.bf16.mxu1 %v3384_v33  ;;  %v772_v29 = vld [vmem:[%s5075_s3 + $0x7a8] sm:$0xff]  ;;  %v108_v30 = vrot.slane %v4242_v15, %v107_v20  ;;  %v3429_v33 = vcombine.low %v759_v12, %v763_v17 }
 0x139   :  { %v3440_v36 = vcombine.high %v768_v28, %v772_v29  ;;  %v776_v15 = vld [vmem:[%s5075_s3 + $0x7c8] sm:$0xff]  ;;  %v3439_v42 = vcombine.low %v768_v28, %v772_v29  ;;  %v573_v29 = vld [vmem:[%s5075_s3 + $0x170] sm:$0xff] }
 0x13b   :  { %2161 = vmatpush1.bf16.msra.mxu0 %v3381_v38  ;;  %2243 = vmatpush1.bf16.msra.mxu1 %v3383_v39  ;;  %v779_v38 = vld [vmem:[%s5075_s3 + $0x7e0] sm:$0xff]  ;;  %v780_v39 = vld [vmem:[%s5075_s3 + $0x7e8] sm:$0xff] }
 0x13c   :  { %2162 = vmatprep.subr.bf16.mxu0 %v3390_v40  ;;  %2244 = vmatprep.subr.bf16.mxu1 %v3392_v41  ;;  %v513_v40 = vadd.f32 %v4323_v3, %v108_v30  ;;  %v3437_v41 = vcombine.low %v767_v25, %v771_v26  ;;  %v3446_v43 = vcombine.high %v775_v37, %v779_v38  ;;  %v530_v3 = vld [vmem:[%s5075_s3 + $0x18] sm:$0xff]  ;;  %v569_v25 = vld [vmem:[%s5075_s3 + $0x150] sm:$0xff] }
 0x13d   :  { %v3448_v44 = vcombine.high %v776_v15, %v780_v39  ;;  %v3447_v50 = vcombine.low %v776_v15, %v780_v39  ;;  %v581_v15 = vld [vmem:[%s5075_s3 + $0x1b0] sm:$0xff] }
 0x13f   :  { %2163 = vmatpush1.bf16.msra.mxu0 %v3389_v46  ;;  %2245 = vmatpush1.bf16.msra.mxu1 %v3391_v47  ;;  %v533_v46 = vld [vmem:[%s5075_s3 + $0x30] sm:$0xff]  ;;  %v534_v47 = vld [vmem:[%s5075_s3 + $0x38] sm:$0xff] }
 0x140   :  { %2164 = vmatprep.subr.bf16.mxu0 %v3398_v48  ;;  %2246 = vmatprep.subr.bf16.mxu1 %v3400_v49  ;;  %v521_v48 = vmax.f32 %v513_v40, 0.0  ;;  %v3445_v49 = vcombine.low %v775_v37, %v779_v38  ;;  %v3202_v51 = vcombine.high %v529_v45, %v533_v46  ;;  %v3204_v52 = vcombine.high %v530_v3, %v534_v47  ;;  %v578_v40 = vld [vmem:[%s5075_s3 + $0x198] sm:$0xff] }
 0x141   :  { %v3201_v59 = vcombine.low %v529_v45, %v533_v46  ;;  %v3203_v60 = vcombine.low %v530_v3, %v534_v47  ;;  %v3242_v38 = vcombine.high %v569_v25, %v573_v29  ;;  %v589_v46 = vld [vmem:[%s5075_s3 + $0x1f0] sm:$0xff]  ;;  %v586_v47 = vld [vmem:[%s5075_s3 + $0x1d8] sm:$0xff] }
 0x143   :  { %2165 = vmatpush1.bf16.msra.mxu0 %v3397_v54  ;;  %2247 = vmatpush1.bf16.msra.mxu1 %v3399_v56  ;;  %v4469_v54 = vpack.c.bf16 %v521_v48, %v521_v48  ;;  %v541_v56 = vld [vmem:[%s5075_s3 + $0x70] sm:$0xff]  ;;  %v590_v48 = vld [vmem:[%s5075_s3 + $0x1f8] sm:$0xff] }
 0x144   :  { %2166 = vmatprep.subr.bf16.mxu0 %v3406_v57  ;;  %2248 = vmatprep.subr.bf16.mxu1 %v3408_v58  ;;  %v538_v57 = vld [vmem:[%s5075_s3 + $0x58] sm:$0xff]  ;;  %v3210_v61 = vcombine.high %v537_v53, %v541_v56  ;;  %v3209_v4 = vcombine.low %v537_v53, %v541_v56  ;;  %v597_v53 = vld [vmem:[%s5075_s3 + $0x230] sm:$0xff]  ;;  %v3260_v56 = vcombine.high %v586_v47, %v590_v48 }
 0x145   :  { %v542_v58 = vld [vmem:[%s5075_s3 + $0x78] sm:$0xff] }
 0x146   :  { %v3212_v62 = vcombine.high %v538_v57, %v542_v58  ;;  %v3211_v6 = vcombine.low %v538_v57, %v542_v58  ;;  %v594_v57 = vld [vmem:[%s5075_s3 + $0x218] sm:$0xff] }
 0x147   :  { %2167 = vmatpush1.bf16.msra.mxu0 %v3405_v63  ;;  %2249 = vmatpush1.bf16.msra.mxu1 %v3407_v0  ;;  %v545_v63 = vld [vmem:[%s5075_s3 + $0x90] sm:$0xff]  ;;  %v598_v58 = vld [vmem:[%s5075_s3 + $0x238] sm:$0xff] }
 0x148   :  { %2168 = vmatprep.subr.bf16.mxu0 %v3414_v1  ;;  %2250 = vmatprep.subr.bf16.mxu1 %v3416_v2  ;;  %v549_v0 = vld [vmem:[%s5075_s3 + $0xb0] sm:$0xff]  ;;  %v546_v1 = vld [vmem:[%s5075_s3 + $0x98] sm:$0xff] }
 0x149   :  { %v550_v2 = vld [vmem:[%s5075_s3 + $0xb8] sm:$0xff]  ;;  %v3218_v7 = vcombine.high %v545_v63, %v549_v0  ;;  %v3217_v12 = vcombine.low %v545_v63, %v549_v0 }
 0x14a   :  { %v3219_v17 = vcombine.low %v546_v1, %v550_v2  ;;  %v602_v0 = vld [vmem:[%s5075_s3 + $0x258] sm:$0xff] }
 0x14b   :  { %2169 = vmatpush1.bf16.msra.mxu0 %v3413_v8  ;;  %2251 = vmatpush1.bf16.msra.mxu1 %v3415_v9  ;;  %v557_v8 = vld [vmem:[%s5075_s3 + $0xf0] sm:$0xff]  ;;  %v3220_v9 = vcombine.high %v546_v1, %v550_v2  ;;  %v606_v1 = vld [vmem:[%s5075_s3 + $0x278] sm:$0xff]  ;;  %v3268_v2 = vcombine.high %v594_v57, %v598_v58 }
 0x14c   :  { %2170 = vmatprep.subr.bf16.mxu0 %v3422_v10  ;;  %2252 = vmatprep.subr.bf16.mxu1 %v3424_v11  ;;  %v554_v10 = vld [vmem:[%s5075_s3 + $0xd8] sm:$0xff]  ;;  %v3226_v18 = vcombine.high %v553_v5, %v557_v8 }
 0x14d   :  { %v558_v11 = vld [vmem:[%s5075_s3 + $0xf8] sm:$0xff] }
 0x14e   :  { %v3227_v26 = vcombine.low %v554_v10, %v558_v11 }
 0x14f   :  { %2171 = vmatpush1.bf16.msra.mxu0 %v3421_v21  ;;  %2253 = vmatpush1.bf16.msra.mxu1 %v3423_v22  ;;  %v3228_v21 = vcombine.high %v554_v10, %v558_v11  ;;  %v562_v22 = vld [vmem:[%s5075_s3 + $0x118] sm:$0xff]  ;;  %v3276_v11 = vcombine.high %v602_v0, %v606_v1 }
 0x150   :  { %2172 = vmatprep.subr.bf16.mxu0 %v3430_v23  ;;  %2254 = vmatprep.subr.bf16.mxu1 %v3432_v24  ;;  %v566_v23 = vld [vmem:[%s5075_s3 + $0x138] sm:$0xff]  ;;  %v3225_v24 = vcombine.low %v553_v5, %v557_v8  ;;  %v609_v5 = vld [vmem:[%s5075_s3 + $0x290] sm:$0xff] }
 0x151   :  { %v3236_v30 = vcombine.high %v562_v22, %v566_v23  ;;  %v3235_v37 = vcombine.low %v562_v22, %v566_v23  ;;  %v614_v10 = vld [vmem:[%s5075_s3 + $0x2b8] sm:$0xff] }
 0x152   :  { %v622_v22 = vld [vmem:[%s5075_s3 + $0x2f8] sm:$0xff] }
 0x153   :  { %2173 = vmatpush1.bf16.msra.mxu0 %v3429_v33  ;;  %2255 = vmatpush1.bf16.msra.mxu1 %v3431_v34  ;;  %v570_v33 = vld [vmem:[%s5075_s3 + $0x158] sm:$0xff] }
 0x154   :  { %2174 = vmatprep.subr.bf16.mxu0 %v3438_v35  ;;  %2256 = vmatprep.subr.bf16.mxu1 %v3440_v36  ;;  %v574_v34 = vld [vmem:[%s5075_s3 + $0x178] sm:$0xff]  ;;  %v577_v36 = vld [vmem:[%s5075_s3 + $0x190] sm:$0xff] }
 0x155   :  { %v3244_v39 = vcombine.high %v570_v33, %v574_v34  ;;  %v3250_v45 = vcombine.high %v577_v36, %v581_v15 }
 0x157   :  { %2175 = vmatpush1.bf16.msra.mxu0 %v3437_v41  ;;  %2257 = vmatpush1.bf16.msra.mxu1 %v3439_v42  ;;  %v582_v41 = vld [vmem:[%s5075_s3 + $0x1b8] sm:$0xff]  ;;  %v3241_v42 = vcombine.low %v569_v25, %v573_v29  ;;  %v625_v25 = vld [vmem:[%s5075_s3 + $0x310] sm:$0xff] }
 0x158   :  { %2176 = vmatprep.subr.bf16.mxu0 %v3446_v43  ;;  %2258 = vmatprep.subr.bf16.mxu1 %v3448_v44  ;;  %v585_v43 = vld [vmem:[%s5075_s3 + $0x1d0] sm:$0xff]  ;;  %v3243_v44 = vcombine.low %v570_v33, %v574_v34  ;;  %v3252_v3 = vcombine.high %v578_v40, %v582_v41  ;;  %v630_v33 = vld [vmem:[%s5075_s3 + $0x338] sm:$0xff] }
 0x15b   :  { %2177 = vmatpush1.bf16.msra.mxu0 %v3445_v49  ;;  %2259 = vmatpush1.bf16.msra.mxu1 %v3447_v50  ;;  %v3249_v49 = vcombine.low %v577_v36, %v581_v15  ;;  %v593_v50 = vld [vmem:[%s5075_s3 + $0x210] sm:$0xff] }
 0x15c   :  { %2269 = vmatprep.subr.bf16.mxu0 %v3202_v51  ;;  %2351 = vmatprep.subr.bf16.mxu1 %v3204_v52  ;;  %v3251_v51 = vcombine.low %v578_v40, %v582_v41  ;;  %v3258_v52 = vcombine.high %v585_v43, %v589_v46  ;;  %v3266_v63 = vcombine.high %v593_v50, %v597_v53  ;;  %v633_v36 = vld [vmem:[%s5075_s3 + $0x350] sm:$0xff]  ;;  %v638_v40 = vld [vmem:[%s5075_s3 + $0x378] sm:$0xff] }
 0x15e   :  { %2179 = vmatmul.mubr.bf16.vlgmr.msra.gmra.mrb[4].mxu0 %v4469_v54  ;;  %2261 = vmatmul.mubr.bf16.vlgmr.msra.gmra.mrb[4].mxu1 %v4469_v54 }
 0x15f   :  { %2270 = vmatpush1.bf16.msra.mxu0 %v3201_v59  ;;  %2301 = vmatprep.mubr.bf16.mxu0 %v4263_v31  ;;  %v3257_v59 = vcombine.low %v585_v43, %v589_v46  ;;  %v641_v43 = vld [vmem:[%s5075_s3 + $0x390] sm:$0xff] }
 0x160   :  { %2352 = vmatpush1.bf16.msra.mxu1 %v3203_v60  ;;  %2383 = vmatprep.mubr.bf16.mxu1 %v4263_v31  ;;  %v561_v31 = vld [vmem:[%s5075_s3 + $0x110] sm:$0xff] }
 0x161   :  { %2271 = vmatprep.subr.bf16.mxu0 %v3210_v61  ;;  %2353 = vmatprep.subr.bf16.mxu1 %v3212_v62  ;;  %v3234_v28 = vcombine.high %v561_v31, %v565_v19  ;;  %v3233_v35 = vcombine.low %v561_v31, %v565_v19  ;;  %v601_v60 = vld [vmem:[%s5075_s3 + $0x250] sm:$0xff]  ;;  %v3259_v62 = vcombine.low %v586_v47, %v590_v48  ;;  %v646_v47 = vld [vmem:[%s5075_s3 + $0x3b8] sm:$0xff] }
 0x162   :  { %v605_v61 = vld [vmem:[%s5075_s3 + $0x270] sm:$0xff] }
 0x163   :  { %2272 = vmatpush1.bf16.msra.mxu0 %v3209_v4  ;;  %v3265_v4 = vcombine.low %v593_v50, %v597_v53  ;;  %v3274_v8 = vcombine.high %v601_v60, %v605_v61  ;;  %v617_v31 = vld [vmem:[%s5075_s3 + $0x2d0] sm:$0xff] }
 0x164   :  { %2354 = vmatpush1.bf16.msra.mxu1 %v3211_v6  ;;  %2273 = vmatprep.subr.bf16.mxu0 %v3218_v7  ;;  %v613_v6 = vld [vmem:[%s5075_s3 + $0x2b0] sm:$0xff]  ;;  %v3267_v7 = vcombine.low %v594_v57, %v598_v58  ;;  %v654_v57 = vld [vmem:[%s5075_s3 + $0x3f8] sm:$0xff] }
 0x165   :  { %2355 = vmatprep.subr.bf16.mxu1 %v3220_v9  ;;  %v610_v9 = vld [vmem:[%s5075_s3 + $0x298] sm:$0xff]  ;;  %v3282_v19 = vcombine.high %v609_v5, %v613_v6  ;;  %v649_v50 = vld [vmem:[%s5075_s3 + $0x3d0] sm:$0xff] }
 0x166   :  { %v3284_v23 = vcombine.high %v610_v9, %v614_v10 }
 0x167   :  { %2274 = vmatpush1.bf16.msra.mxu0 %v3217_v12  ;;  %v3273_v12 = vcombine.low %v601_v60, %v605_v61 }
 0x168   :  { %2356 = vmatpush1.bf16.msra.mxu1 %v3219_v17  ;;  %2275 = vmatprep.subr.bf16.mxu0 %v3226_v18  ;;  %v621_v17 = vld [vmem:[%s5075_s3 + $0x2f0] sm:$0xff]  ;;  %v3275_v18 = vcombine.low %v602_v0, %v606_v1  ;;  %v658_v1 = vld [vmem:[%s5075_s3 + $0x418] sm:$0xff] }
 0x169   :  { %2357 = vmatprep.subr.bf16.mxu1 %v3228_v21  ;;  %v618_v21 = vld [vmem:[%s5075_s3 + $0x2d8] sm:$0xff]  ;;  %v3290_v29 = vcombine.high %v617_v31, %v621_v17  ;;  %v661_v0 = vld [vmem:[%s5075_s3 + $0x430] sm:$0xff] }
 0x16a   :  { %v3292_v34 = vcombine.high %v618_v21, %v622_v22 }
 0x16b   :  { %2276 = vmatpush1.bf16.msra.mxu0 %v3225_v24  ;;  %v3281_v24 = vcombine.low %v609_v5, %v613_v6 }
 0x16c   :  { %2358 = vmatpush1.bf16.msra.mxu1 %v3227_v26  ;;  %2277 = vmatprep.subr.bf16.mxu0 %v3234_v28  ;;  %v629_v26 = vld [vmem:[%s5075_s3 + $0x330] sm:$0xff]  ;;  %v3283_v28 = vcombine.low %v610_v9, %v614_v10 }
 0x16d   :  { %2359 = vmatprep.subr.bf16.mxu1 %v3236_v30  ;;  %v626_v30 = vld [vmem:[%s5075_s3 + $0x318] sm:$0xff]  ;;  %v3298_v15 = vcombine.high %v625_v25, %v629_v26  ;;  %v669_v9 = vld [vmem:[%s5075_s3 + $0x470] sm:$0xff] }
 0x16e   :  { %v3300_v41 = vcombine.high %v626_v30, %v630_v33 }
 0x16f   :  { %2278 = vmatpush1.bf16.msra.mxu0 %v3233_v35  ;;  %v3289_v35 = vcombine.low %v617_v31, %v621_v17 }
 0x170   :  { %2360 = vmatpush1.bf16.msra.mxu1 %v3235_v37  ;;  %2279 = vmatprep.subr.bf16.mxu0 %v3242_v38  ;;  %v637_v37 = vld [vmem:[%s5075_s3 + $0x370] sm:$0xff]  ;;  %v3291_v38 = vcombine.low %v618_v21, %v622_v22  ;;  %v674_v22 = vld [vmem:[%s5075_s3 + $0x498] sm:$0xff] }
 0x171   :  { %2361 = vmatprep.subr.bf16.mxu1 %v3244_v39  ;;  %v634_v39 = vld [vmem:[%s5075_s3 + $0x358] sm:$0xff]  ;;  %v3306_v46 = vcombine.high %v633_v36, %v637_v37 }
 0x172   :  { %v3308_v48 = vcombine.high %v634_v39, %v638_v40 }
 0x173   :  { %2280 = vmatpush1.bf16.msra.mxu0 %v3241_v42  ;;  %v3297_v42 = vcombine.low %v625_v25, %v629_v26 }
 0x174   :  { %2362 = vmatpush1.bf16.msra.mxu1 %v3243_v44  ;;  %2281 = vmatprep.subr.bf16.mxu0 %v3250_v45  ;;  %v645_v44 = vld [vmem:[%s5075_s3 + $0x3b0] sm:$0xff]  ;;  %v3299_v45 = vcombine.low %v626_v30, %v630_v33  ;;  %v686_v33 = vld [vmem:[%s5075_s3 + $0x4f8] sm:$0xff] }
 0x175   :  { %2363 = vmatprep.subr.bf16.mxu1 %v3252_v3  ;;  %v642_v3 = vld [vmem:[%s5075_s3 + $0x398] sm:$0xff]  ;;  %v3314_v53 = vcombine.high %v641_v43, %v645_v44  ;;  %v685_v30 = vld [vmem:[%s5075_s3 + $0x4f0] sm:$0xff] }
 0x176   :  { %v3316_v58 = vcombine.high %v642_v3, %v646_v47  ;;  %v3315_v60 = vcombine.low %v642_v3, %v646_v47  ;;  %v702_v3 = vld [vmem:[%s5075_s3 + $0x578] sm:$0xff] }
 0x177   :  { %2282 = vmatpush1.bf16.msra.mxu0 %v3249_v49  ;;  %v3305_v49 = vcombine.low %v633_v36, %v637_v37  ;;  %v689_v37 = vld [vmem:[%s5075_s3 + $0x510] sm:$0xff] }
 0x178   :  { %2364 = vmatpush1.bf16.msra.mxu1 %v3251_v51  ;;  %2283 = vmatprep.subr.bf16.mxu0 %v3258_v52  ;;  %v653_v51 = vld [vmem:[%s5075_s3 + $0x3f0] sm:$0xff]  ;;  %v3307_v52 = vcombine.low %v634_v39, %v638_v40  ;;  %v694_v39 = vld [vmem:[%s5075_s3 + $0x538] sm:$0xff] }
 0x179   :  { %2365 = vmatprep.subr.bf16.mxu1 %v3260_v56  ;;  %v650_v56 = vld [vmem:[%s5075_s3 + $0x3d8] sm:$0xff]  ;;  %v3322_v61 = vcombine.high %v649_v50, %v653_v51 }
 0x17a   :  { %v3323_v5 = vcombine.low %v650_v56, %v654_v57 }
 0x17b   :  { %2284 = vmatpush1.bf16.msra.mxu0 %v3257_v59  ;;  %v3313_v59 = vcombine.low %v641_v43, %v645_v44  ;;  %v697_v44 = vld [vmem:[%s5075_s3 + $0x550] sm:$0xff] }
 0x17c   :  { %2366 = vmatpush1.bf16.msra.mxu1 %v3259_v62  ;;  %2285 = vmatprep.subr.bf16.mxu0 %v3266_v63  ;;  %v3324_v62 = vcombine.high %v650_v56, %v654_v57  ;;  %v657_v63 = vld [vmem:[%s5075_s3 + $0x410] sm:$0xff]  ;;  %v710_v56 = vld [vmem:[%s5075_s3 + $0x5b8] sm:$0xff] }
 0x17d   :  { %2367 = vmatprep.subr.bf16.mxu1 %v3268_v2  ;;  %v662_v2 = vld [vmem:[%s5075_s3 + $0x438] sm:$0xff]  ;;  %v3330_v6 = vcombine.high %v657_v63, %v661_v0  ;;  %v3329_v10 = vcombine.low %v657_v63, %v661_v0 }
 0x17e   :  { %v3331_v31 = vcombine.low %v658_v1, %v662_v2  ;;  %v714_v63 = vld [vmem:[%s5075_s3 + $0x5d8] sm:$0xff] }
 0x17f   :  { %2286 = vmatpush1.bf16.msra.mxu0 %v3265_v4  ;;  %v3321_v4 = vcombine.low %v649_v50, %v653_v51  ;;  %v705_v51 = vld [vmem:[%s5075_s3 + $0x590] sm:$0xff]  ;;  %v718_v0 = vld [vmem:[%s5075_s3 + $0x5f8] sm:$0xff] }
 0x180   :  { %2368 = vmatpush1.bf16.msra.mxu1 %v3267_v7  ;;  %2287 = vmatprep.subr.bf16.mxu0 %v3274_v8  ;;  %v3332_v7 = vcombine.high %v658_v1, %v662_v2  ;;  %v665_v8 = vld [vmem:[%s5075_s3 + $0x450] sm:$0xff] }
 0x181   :  { %2369 = vmatprep.subr.bf16.mxu1 %v3276_v11  ;;  %v666_v11 = vld [vmem:[%s5075_s3 + $0x458] sm:$0xff]  ;;  %v3338_v17 = vcombine.high %v665_v8, %v669_v9 }
 0x183   :  { %2288 = vmatpush1.bf16.msra.mxu0 %v3273_v12  ;;  %v670_v12 = vld [vmem:[%s5075_s3 + $0x478] sm:$0xff] }
 0x184   :  { %2370 = vmatpush1.bf16.msra.mxu1 %v3275_v18  ;;  %2289 = vmatprep.subr.bf16.mxu0 %v3282_v19  ;;  %v673_v18 = vld [vmem:[%s5075_s3 + $0x490] sm:$0xff]  ;;  %v3340_v21 = vcombine.high %v666_v11, %v670_v12  ;;  %v3339_v25 = vcombine.low %v666_v11, %v670_v12  ;;  %v3387_v11 = vcombine.low %v714_v63, %v718_v0 }
 0x185   :  { %2371 = vmatprep.subr.bf16.mxu1 %v3284_v23  ;;  %v677_v19 = vld [vmem:[%s5075_s3 + $0x4b0] sm:$0xff]  ;;  %v678_v23 = vld [vmem:[%s5075_s3 + $0x4b8] sm:$0xff] }
 0x186   :  { %v3346_v26 = vcombine.high %v673_v18, %v677_v19 }
 0x187   :  { %2290 = vmatpush1.bf16.msra.mxu0 %v3281_v24  ;;  %v3337_v24 = vcombine.low %v665_v8, %v669_v9  ;;  %v722_v8 = vld [vmem:[%s5075_s3 + $0x618] sm:$0xff] }
 0x188   :  { %2372 = vmatpush1.bf16.msra.mxu1 %v3283_v28  ;;  %2291 = vmatprep.subr.bf16.mxu0 %v3290_v29  ;;  %v3348_v28 = vcombine.high %v674_v22, %v678_v23  ;;  %v681_v29 = vld [vmem:[%s5075_s3 + $0x4d0] sm:$0xff]  ;;  %v726_v9 = vld [vmem:[%s5075_s3 + $0x638] sm:$0xff] }
 0x189   :  { %2373 = vmatprep.subr.bf16.mxu1 %v3292_v34  ;;  %v3347_v34 = vcombine.low %v674_v22, %v678_v23  ;;  %v3353_v40 = vcombine.low %v681_v29, %v685_v30  ;;  %v3395_v23 = vcombine.low %v722_v8, %v726_v9 }
 0x18b   :  { %2292 = vmatpush1.bf16.msra.mxu0 %v3289_v35  ;;  %v3354_v35 = vcombine.high %v681_v29, %v685_v30  ;;  %v738_v29 = vld [vmem:[%s5075_s3 + $0x698] sm:$0xff] }
 0x18c   :  { %2374 = vmatpush1.bf16.msra.mxu1 %v3291_v38  ;;  %2293 = vmatprep.subr.bf16.mxu0 %v3298_v15  ;;  %v693_v38 = vld [vmem:[%s5075_s3 + $0x530] sm:$0xff]  ;;  %v690_v15 = vld [vmem:[%s5075_s3 + $0x518] sm:$0xff] }
 0x18d   :  { %2375 = vmatprep.subr.bf16.mxu1 %v3300_v41  ;;  %v3364_v43 = vcombine.high %v690_v15, %v694_v39  ;;  %v3361_v47 = vcombine.low %v689_v37, %v693_v38  ;;  %v742_v30 = vld [vmem:[%s5075_s3 + $0x6b8] sm:$0xff] }
 0x18f   :  { %2294 = vmatpush1.bf16.msra.mxu0 %v3297_v42  ;;  %v3362_v42 = vcombine.high %v689_v37, %v693_v38  ;;  %v746_v37 = vld [vmem:[%s5075_s3 + $0x6d8] sm:$0xff] }
 0x190   :  { %2376 = vmatpush1.bf16.msra.mxu1 %v3299_v45  ;;  %2295 = vmatprep.subr.bf16.mxu0 %v3306_v46  ;;  %v701_v45 = vld [vmem:[%s5075_s3 + $0x570] sm:$0xff]  ;;  %v698_v46 = vld [vmem:[%s5075_s3 + $0x558] sm:$0xff] }
 0x191   :  { %2377 = vmatprep.subr.bf16.mxu1 %v3308_v48  ;;  %v3363_v48 = vcombine.low %v690_v15, %v694_v39  ;;  %v3372_v50 = vcombine.high %v698_v46, %v702_v3  ;;  %v3369_v57 = vcombine.low %v697_v44, %v701_v45  ;;  %v750_v38 = vld [vmem:[%s5075_s3 + $0x6f8] sm:$0xff]  ;;  %v3411_v39 = vcombine.low %v738_v29, %v742_v30 }
 0x193   :  { %2296 = vmatpush1.bf16.msra.mxu0 %v3305_v49  ;;  %v3370_v49 = vcombine.high %v697_v44, %v701_v45  ;;  %v754_v44 = vld [vmem:[%s5075_s3 + $0x718] sm:$0xff] }
 0x194   :  { %2378 = vmatpush1.bf16.msra.mxu1 %v3307_v52  ;;  %2297 = vmatprep.subr.bf16.mxu0 %v3314_v53  ;;  %v709_v52 = vld [vmem:[%s5075_s3 + $0x5b0] sm:$0xff]  ;;  %v706_v53 = vld [vmem:[%s5075_s3 + $0x598] sm:$0xff] }
 0x195   :  { %2379 = vmatprep.subr.bf16.mxu1 %v3316_v58  ;;  %v3371_v58 = vcombine.low %v698_v46, %v702_v3  ;;  %v3377_v1 = vcombine.low %v705_v51, %v709_v52  ;;  %v3379_v2 = vcombine.low %v706_v53, %v710_v56  ;;  %v758_v45 = vld [vmem:[%s5075_s3 + $0x738] sm:$0xff]  ;;  %v3419_v3 = vcombine.low %v746_v37, %v750_v38 }
 0x197   :  { %2298 = vmatpush1.bf16.msra.mxu0 %v3313_v59  ;;  %v3378_v59 = vcombine.high %v705_v51, %v709_v52  ;;  %v762_v51 = vld [vmem:[%s5075_s3 + $0x758] sm:$0xff] }
 0x198   :  { %2380 = vmatpush1.bf16.msra.mxu1 %v3315_v60  ;;  %2299 = vmatprep.subr.bf16.mxu0 %v3322_v61  ;;  %v3380_v60 = vcombine.high %v706_v53, %v710_v56  ;;  %v713_v61 = vld [vmem:[%s5075_s3 + $0x5d0] sm:$0xff]  ;;  %v766_v52 = vld [vmem:[%s5075_s3 + $0x778] sm:$0xff]  ;;  %v3427_v56 = vcombine.low %v754_v44, %v758_v45 }
 0x199   :  { %2381 = vmatprep.subr.bf16.mxu1 %v3324_v62  ;;  %v717_v62 = vld [vmem:[%s5075_s3 + $0x5f0] sm:$0xff] }
 0x19b   :  { %2300 = vmatpush1.bf16.msra.mxu0 %v3321_v4  ;;  %v3386_v4 = vcombine.high %v713_v61, %v717_v62 }
 0x19c   :  { %2382 = vmatpush1.bf16.msra.mxu1 %v3323_v5  ;;  %2310 = vmatprep.subr.bf16.mxu0 %v3330_v6  ;;  %v3388_v5 = vcombine.high %v714_v63, %v718_v0  ;;  %v721_v6 = vld [vmem:[%s5075_s3 + $0x610] sm:$0xff]  ;;  %v3435_v0 = vcombine.low %v762_v51, %v766_v52 }
 0x19d   :  { %2392 = vmatprep.subr.bf16.mxu1 %v3332_v7  ;;  %v725_v7 = vld [vmem:[%s5075_s3 + $0x630] sm:$0xff] }
 0x19e   :  { %2302 = vmatmul.mubr.bf16.vlgmr.msra.gmra.mrb[8].mxu0 %v4265_v32  ;;  %v3394_v12 = vcombine.high %v721_v6, %v725_v7  ;;  %v3393_v22 = vcombine.low %v721_v6, %v725_v7  ;;  %v778_v6 = vld [vmem:[%s5075_s3 + $0x7d8] sm:$0xff] }
 0x19f   :  { %2384 = vmatmul.mubr.bf16.vlgmr.msra.gmra.mrb[8].mxu1 %v4265_v32  ;;  %2311 = vmatpush1.bf16.msra.mxu0 %v3329_v10  ;;  %v682_v32 = vld [vmem:[%s5075_s3 + $0x4d8] sm:$0xff]  ;;  %v3385_v10 = vcombine.low %v713_v61, %v717_v62 }
 0x1a0   :  { %2342 = vmatprep.mubr.bf16.mxu0 %v4349_v27  ;;  %2393 = vmatpush1.bf16.msra.mxu1 %v3331_v31  ;;  %v3356_v36 = vcombine.high %v682_v32, %v686_v33  ;;  %v3355_v41 = vcombine.low %v682_v32, %v686_v33  ;;  %v3396_v31 = vcombine.high %v722_v8, %v726_v9  ;;  %v770_v61 = vld [vmem:[%s5075_s3 + $0x798] sm:$0xff] }
 0x1a1   :  { %2424 = vmatprep.mubr.bf16.mxu1 %v4349_v27  ;;  %2312 = vmatprep.subr.bf16.mxu0 %v3338_v17  ;;  %v3345_v27 = vcombine.low %v673_v18, %v677_v19  ;;  %v729_v17 = vld [vmem:[%s5075_s3 + $0x650] sm:$0xff]  ;;  %v730_v19 = vld [vmem:[%s5075_s3 + $0x658] sm:$0xff] }
 0x1a2   :  { %2394 = vmatprep.subr.bf16.mxu1 %v3340_v21  ;;  %v733_v18 = vld [vmem:[%s5075_s3 + $0x670] sm:$0xff]  ;;  %v734_v21 = vld [vmem:[%s5075_s3 + $0x678] sm:$0xff] }
 0x1a3   :  { %2313 = vmatpush1.bf16.msra.mxu0 %v3337_v24  ;;  %v3402_v24 = vcombine.high %v729_v17, %v733_v18  ;;  %v3401_v32 = vcombine.low %v729_v17, %v733_v18  ;;  %v3403_v33 = vcombine.low %v730_v19, %v734_v21  ;;  %v774_v62 = vld [vmem:[%s5075_s3 + $0x7b8] sm:$0xff]  ;;  %v3726_v17 = vld [vmem:[%s5077_s5 + $0x40] sm:$0xff]  }
 0x1a4   :  { %2395 = vmatpush1.bf16.msra.mxu1 %v3339_v25  ;;  %2314 = vmatprep.subr.bf16.mxu0 %v3346_v26  ;;  %v3404_v25 = vcombine.high %v730_v19, %v734_v21  ;;  %v737_v26 = vld [vmem:[%s5075_s3 + $0x690] sm:$0xff]  ;;  %v782_v7 = vld [vmem:[%s5075_s3 + $0x7f8] sm:$0xff]  ;;  %v3443_v9 = vcombine.low %v770_v61, %v774_v62  ;;  %v3727_v18 = vld [vmem:[%s5077_s5 + $0xc0] sm:$0xff]  }
 0x1a5   :  { %2396 = vmatprep.subr.bf16.mxu1 %v3348_v28  ;;  %v741_v28 = vld [vmem:[%s5075_s3 + $0x6b0] sm:$0xff]  ;;  %v3728_v19 = vld [vmem:[%s5077_s5] sm:$0xff]  }
 0x1a6   :  { %v3409_v15 = vcombine.low %v737_v26, %v741_v28  ;;  %v3729_v21 = vld [vmem:[%s5077_s5 + $0x80] sm:$0xff]  }
 0x1a7   :  { %2315 = vmatpush1.bf16.msra.mxu0 %v3345_v27  ;;  %v3410_v27 = vcombine.high %v737_v26, %v741_v28  ;;  %v3734_v26 = vld [vmem:[%s5077_s5 + $0x50] sm:$0xff]  }
 0x1a8   :  { %2397 = vmatpush1.bf16.msra.mxu1 %v3347_v34  ;;  %2316 = vmatprep.subr.bf16.mxu0 %v3354_v35  ;;  %v3412_v34 = vcombine.high %v738_v29, %v742_v30  ;;  %v745_v35 = vld [vmem:[%s5075_s3 + $0x6d0] sm:$0xff]  ;;  %v3738_v30 = vld [vmem:[%s5077_s5 + $0x58] sm:$0xff]  }
 0x1a9   :  { %2398 = vmatprep.subr.bf16.mxu1 %v3356_v36  ;;  %v749_v36 = vld [vmem:[%s5075_s3 + $0x6f0] sm:$0xff] }
 0x1aa   :  { %v3417_v46 = vcombine.low %v745_v35, %v749_v36  ;;  %v3736_v28 = vld [vmem:[%s5077_s5 + $0x10] sm:$0xff]  }
 0x1ab   :  { %2317 = vmatpush1.bf16.msra.mxu0 %v3353_v40  ;;  %v3418_v40 = vcombine.high %v745_v35, %v749_v36  ;;  %v3737_v29 = vld [vmem:[%s5077_s5 + $0x90] sm:$0xff]   ;;  %v3743_v35 = vld [vmem:[%s5077_s5 + $0xe0] sm:$0xff]  }
 0x1ac   :  { %2399 = vmatpush1.bf16.msra.mxu1 %v3355_v41  ;;  %2318 = vmatprep.subr.bf16.mxu0 %v3362_v42  ;;  %v3420_v41 = vcombine.high %v746_v37, %v750_v38  ;;  %v753_v42 = vld [vmem:[%s5075_s3 + $0x710] sm:$0xff]  ;;  %v3744_v36 = vld [vmem:[%s5077_s5 + $0x20] sm:$0xff]   ;;  %v3746_v38 = vld [vmem:[%s5077_s5 + $0x68] sm:$0xff]  }
 0x1ad   :  { %2400 = vmatprep.subr.bf16.mxu1 %v3364_v43  ;;  %v757_v43 = vld [vmem:[%s5075_s3 + $0x730] sm:$0xff]  ;;  %v3745_v37 = vld [vmem:[%s5077_s5 + $0xa0] sm:$0xff]  }
 0x1ae   :  { %v3425_v53 = vcombine.low %v753_v42, %v757_v43 }
 0x1af   :  { %2319 = vmatpush1.bf16.msra.mxu0 %v3361_v47  ;;  %v3426_v47 = vcombine.high %v753_v42, %v757_v43  ;;  %v3751_v42 = vld [vmem:[%s5077_s5 + $0xf0] sm:$0xff]  }
 0x1b0   :  { %2401 = vmatpush1.bf16.msra.mxu1 %v3363_v48  ;;  %2320 = vmatprep.subr.bf16.mxu0 %v3370_v49  ;;  %v3428_v48 = vcombine.high %v754_v44, %v758_v45  ;;  %v761_v49 = vld [vmem:[%s5075_s3 + $0x750] sm:$0xff]  ;;  %v3754_v45 = vld [vmem:[%s5077_s5 + $0x78] sm:$0xff]  }
 0x1b1   :  { %2402 = vmatprep.subr.bf16.mxu1 %v3372_v50  ;;  %v765_v50 = vld [vmem:[%s5075_s3 + $0x770] sm:$0xff] }
 0x1b2   :  { %v3433_v63 = vcombine.low %v761_v49, %v765_v50  ;;  %v3752_v43 = vld [vmem:[%s5077_s5 + $0x30] sm:$0xff]  }
 0x1b3   :  { %2321 = vmatpush1.bf16.msra.mxu0 %v3369_v57  ;;  %v3434_v57 = vcombine.high %v761_v49, %v765_v50  ;;  %v3753_v44 = vld [vmem:[%s5077_s5 + $0xb0] sm:$0xff]   ;;  %v3759_v49 = vld [vmem:[%s5077_s5 + $0x1c0] sm:$0xff]  }
 0x1b4   :  { %2403 = vmatpush1.bf16.msra.mxu1 %v3371_v58  ;;  %2322 = vmatprep.subr.bf16.mxu0 %v3378_v59  ;;  %v3436_v58 = vcombine.high %v762_v51, %v766_v52  ;;  %v769_v59 = vld [vmem:[%s5075_s3 + $0x790] sm:$0xff]  ;;  %v4955_v50 = vld [vmem:[%s5078_s4] sm:$0xff] }
 0x1b5   :  { %2404 = vmatprep.subr.bf16.mxu1 %v3380_v60  ;;  %v773_v60 = vld [vmem:[%s5075_s3 + $0x7b0] sm:$0xff]  ;;  %v788_v51 = vrot.slane %v4955_v50, %v99_v14  ;;  %v796_v52 = vrot.slane %v4955_v50, %v107_v20 }
 0x1b6   :  { %v3441_v8 = vcombine.low %v769_v59, %v773_v60 }
 0x1b7   :  { %2323 = vmatpush1.bf16.msra.mxu0 %v3377_v1  ;;  %v3442_v1 = vcombine.high %v769_v59, %v773_v60 }
 0x1b8   :  { %2405 = vmatpush1.bf16.msra.mxu1 %v3379_v2  ;;  %2324 = vmatprep.subr.bf16.mxu0 %v3386_v4  ;;  %v3444_v2 = vcombine.high %v770_v61, %v774_v62  ;;  %v777_v4 = vld [vmem:[%s5075_s3 + $0x7d0] sm:$0xff] }
 0x1b9   :  { %2406 = vmatprep.subr.bf16.mxu1 %v3388_v5  ;;  %v781_v5 = vld [vmem:[%s5075_s3 + $0x7f0] sm:$0xff] }
 0x1bb   :  { %2325 = vmatpush1.bf16.msra.mxu0 %v3385_v10  ;;  %v3450_v10 = vcombine.high %v777_v4, %v781_v5 }
 0x1bc   :  { %2407 = vmatpush1.bf16.msra.mxu1 %v3387_v11  ;;  %2326 = vmatprep.subr.bf16.mxu0 %v3394_v12  ;;  %v3452_v11 = vcombine.high %v778_v6, %v782_v7  ;;  %v3449_v12 = vcombine.low %v777_v4, %v781_v5 }
 0x1bd   :  { %2408 = vmatprep.subr.bf16.mxu1 %v3396_v31  ;;  %v3451_v31 = vcombine.low %v778_v6, %v782_v7 }
 0x1bf   :  { %2327 = vmatpush1.bf16.msra.mxu0 %v3393_v22  ;;  %v3730_v22 = vld [vmem:[%s5077_s5 + $0x48] sm:$0xff]  }
 0x1c0   :  { %2409 = vmatpush1.bf16.msra.mxu1 %v3395_v23  ;;  %2328 = vmatprep.subr.bf16.mxu0 %v3402_v24  ;;  %v3731_v23 = vld [vmem:[%s5077_s5 + $0xc8] sm:$0xff]  }
 0x1c1   :  { %2410 = vmatprep.subr.bf16.mxu1 %v3404_v25  ;;  %v3732_v24 = vld [vmem:[%s5077_s5 + $0x8] sm:$0xff]  }
 0x1c2   :  { %v3733_v25 = vld [vmem:[%s5077_s5 + $0x88] sm:$0xff]  }
 0x1c3   :  { %2329 = vmatpush1.bf16.msra.mxu0 %v3401_v32  ;;  %v3739_v32 = vld [vmem:[%s5077_s5 + $0xd8] sm:$0xff]  }
 0x1c4   :  { %2411 = vmatpush1.bf16.msra.mxu1 %v3403_v33  ;;  %2330 = vmatprep.subr.bf16.mxu0 %v3410_v27  ;;  %v3740_v33 = vld [vmem:[%s5077_s5 + $0x18] sm:$0xff]  }
 0x1c5   :  { %2412 = vmatprep.subr.bf16.mxu1 %v3412_v34  ;;  %v3741_v27 = vld [vmem:[%s5077_s5 + $0x98] sm:$0xff]   ;;  %v3742_v34 = vld [vmem:[%s5077_s5 + $0x60] sm:$0xff]  }
 0x1c7   :  { %2331 = vmatpush1.bf16.msra.mxu0 %v3409_v15  ;;  %v3747_v15 = vld [vmem:[%s5077_s5 + $0xe8] sm:$0xff]  }
 0x1c8   :  { %2413 = vmatpush1.bf16.msra.mxu1 %v3411_v39  ;;  %2332 = vmatprep.subr.bf16.mxu0 %v3418_v40  ;;  %v3748_v39 = vld [vmem:[%s5077_s5 + $0x28] sm:$0xff]  }
 0x1c9   :  { %2414 = vmatprep.subr.bf16.mxu1 %v3420_v41  ;;  %v3749_v40 = vld [vmem:[%s5077_s5 + $0xa8] sm:$0xff]   ;;  %v3750_v41 = vld [vmem:[%s5077_s5 + $0x70] sm:$0xff]  }
 0x1cb   :  { %2333 = vmatpush1.bf16.msra.mxu0 %v3417_v46  ;;  %v3755_v46 = vld [vmem:[%s5077_s5 + $0xf8] sm:$0xff]  }
 0x1cc   :  { %2415 = vmatpush1.bf16.msra.mxu1 %v3419_v3  ;;  %2334 = vmatprep.subr.bf16.mxu0 %v3426_v47  ;;  %v3756_v3 = vld [vmem:[%s5077_s5 + $0x38] sm:$0xff]  }
 0x1cd   :  { %2416 = vmatprep.subr.bf16.mxu1 %v3428_v48  ;;  %v3757_v47 = vld [vmem:[%s5077_s5 + $0xb8] sm:$0xff]   ;;  %v3758_v48 = vld [vmem:[%s5077_s5 + $0x140] sm:$0xff]  }
 0x1cf   :  { %2335 = vmatpush1.bf16.msra.mxu0 %v3425_v53  ;;  %v792_v53 = vrot.slane %v4955_v50, %v103_v16 }
 0x1d0   :  { %2417 = vmatpush1.bf16.msra.mxu1 %v3427_v56  ;;  %2336 = vmatprep.subr.bf16.mxu0 %v3434_v57  ;;  %v800_v56 = vrot.slane %v4955_v50, %v111_v55  ;;  %v3760_v55 = vld [vmem:[%s5077_s5 + $0x100] sm:$0xff]  }
 0x1d1   :  { %2418 = vmatprep.subr.bf16.mxu1 %v3436_v58 }
 0x1d3   :  { %2337 = vmatpush1.bf16.msra.mxu0 %v3433_v63 }
 0x1d4   :  { %2419 = vmatpush1.bf16.msra.mxu1 %v3435_v0  ;;  %2338 = vmatprep.subr.bf16.mxu0 %v3442_v1 }
 0x1d5   :  { %2420 = vmatprep.subr.bf16.mxu1 %v3444_v2 }
 0x1d7   :  { %2339 = vmatpush1.bf16.msra.mxu0 %v3441_v8 }
 0x1d8   :  { %2421 = vmatpush1.bf16.msra.mxu1 %v3443_v9  ;;  %2340 = vmatprep.subr.bf16.mxu0 %v3450_v10  ;;  %v3761_v9 = vld [vmem:[%s5077_s5 + $0x180] sm:$0xff]  }
 0x1d9   :  { %2422 = vmatprep.subr.bf16.mxu1 %v3452_v11 }
 0x1db   :  { %2341 = vmatpush1.bf16.msra.mxu0 %v3449_v12  ;;  %v3762_v12 = vld [vmem:[%s5077_s5 + $0x148] sm:$0xff]  }
 0x1dc   :  { %2423 = vmatpush1.bf16.msra.mxu1 %v3451_v31  ;;  %3518 = vmatprep.subr.bf16.mxu0 %v3726_v17  ;;  %v3763_v31 = vld [vmem:[%s5077_s5 + $0x1c8] sm:$0xff]  }
 0x1dd   :  { %3540 = vmatprep.subr.bf16.mxu1 %v3727_v18  ;;  %v3764_v17 = vld [vmem:[%s5077_s5 + $0x108] sm:$0xff]  }
 0x1de   :  { %2343 = vmatmul.mubr.bf16.vlgmr.msra.gmra.mrb[8].mxu0 %v4469_v54  ;;  %v3765_v18 = vld [vmem:[%s5077_s5 + $0x188] sm:$0xff]  }
 0x1df   :  { %2425 = vmatmul.mubr.bf16.vlgmr.msra.gmra.mrb[8].mxu1 %v4469_v54  ;;  %3519 = vmatpush3.bf16.msra.mxu0 %v3728_v19  ;;  %v3735_v54 = vld [vmem:[%s5077_s5 + $0xd0] sm:$0xff]  }
 0x1e0   :  { %3541 = vmatpush3.bf16.msra.mxu1 %v3729_v21  ;;  %3520 = vmatprep.subr.bf16.mxu0 %v3730_v22  ;;  %v3766_v19 = vld [vmem:[%s5077_s5 + $0x150] sm:$0xff]  }
 0x1e1   :  { %3542 = vmatprep.subr.bf16.mxu1 %v3731_v23  ;;  %v3767_v21 = vld [vmem:[%s5077_s5 + $0x1d0] sm:$0xff]  }
 0x1e2   :  { %v3768_v22 = vld [vmem:[%s5077_s5 + $0x110] sm:$0xff]  }
 0x1e3   :  { %3521 = vmatpush3.bf16.msra.mxu0 %v3732_v24  ;;  %v3769_v23 = vld [vmem:[%s5077_s5 + $0x190] sm:$0xff]   ;;  %v3770_v24 = vld [vmem:[%s5077_s5 + $0x158] sm:$0xff]  }
 0x1e4   :  { %3543 = vmatpush3.bf16.msra.mxu1 %v3733_v25  ;;  %3522 = vmatprep.subr.bf16.mxu0 %v3734_v26  ;;  %v3771_v25 = vld [vmem:[%s5077_s5 + $0x1d8] sm:$0xff]  }
 0x1e5   :  { %3544 = vmatprep.subr.bf16.mxu1 %v3735_v54  ;;  %v3772_v26 = vld [vmem:[%s5077_s5 + $0x118] sm:$0xff]  }
 0x1e6   :  { %v3773_v54 = vld [vmem:[%s5077_s5 + $0x198] sm:$0xff]  }
 0x1e7   :  { %3523 = vmatpush3.bf16.msra.mxu0 %v3736_v28  ;;  %v3774_v28 = vld [vmem:[%s5077_s5 + $0x160] sm:$0xff]  }
 0x1e8   :  { %3545 = vmatpush3.bf16.msra.mxu1 %v3737_v29  ;;  %3524 = vmatprep.subr.bf16.mxu0 %v3738_v30  ;;  %v3775_v29 = vld [vmem:[%s5077_s5 + $0x1e0] sm:$0xff]  }
 0x1e9   :  { %3546 = vmatprep.subr.bf16.mxu1 %v3739_v32  ;;  %v3776_v30 = vld [vmem:[%s5077_s5 + $0x120] sm:$0xff]  }
 0x1ea   :  { %v3777_v32 = vld [vmem:[%s5077_s5 + $0x1a0] sm:$0xff]  }
 0x1eb   :  { %3525 = vmatpush3.bf16.msra.mxu0 %v3740_v33  ;;  %v3778_v33 = vld [vmem:[%s5077_s5 + $0x168] sm:$0xff]  }
 0x1ec   :  { %3547 = vmatpush3.bf16.msra.mxu1 %v3741_v27  ;;  %3526 = vmatprep.subr.bf16.mxu0 %v3742_v34  ;;  %v3779_v27 = vld [vmem:[%s5077_s5 + $0x1e8] sm:$0xff]  }
 0x1ed   :  { %3548 = vmatprep.subr.bf16.mxu1 %v3743_v35  ;;  %v3780_v34 = vld [vmem:[%s5077_s5 + $0x128] sm:$0xff]  }
 0x1ee   :  { %v3781_v35 = vld [vmem:[%s5077_s5 + $0x1a8] sm:$0xff]  }
 0x1ef   :  { %3527 = vmatpush3.bf16.msra.mxu0 %v3744_v36  ;;  %v3782_v36 = vld [vmem:[%s5077_s5 + $0x170] sm:$0xff]  }
 0x1f0   :  { %3549 = vmatpush3.bf16.msra.mxu1 %v3745_v37  ;;  %3528 = vmatprep.subr.bf16.mxu0 %v3746_v38  ;;  %v3783_v37 = vld [vmem:[%s5077_s5 + $0x1f0] sm:$0xff]  }
 0x1f1   :  { %3550 = vmatprep.subr.bf16.mxu1 %v3747_v15  ;;  %v3784_v38 = vld [vmem:[%s5077_s5 + $0x130] sm:$0xff]  }
 0x1f2   :  { %v3785_v15 = vld [vmem:[%s5077_s5 + $0x1b0] sm:$0xff]  }
 0x1f3   :  { %3529 = vmatpush3.bf16.msra.mxu0 %v3748_v39  ;;  %v3786_v39 = vld [vmem:[%s5077_s5 + $0x178] sm:$0xff]  }
 0x1f4   :  { %3551 = vmatpush3.bf16.msra.mxu1 %v3749_v40  ;;  %3530 = vmatprep.subr.bf16.mxu0 %v3750_v41  ;;  %v3787_v40 = vld [vmem:[%s5077_s5 + $0x1f8] sm:$0xff]  }
 0x1f5   :  { %3552 = vmatprep.subr.bf16.mxu1 %v3751_v42  ;;  %v3788_v41 = vld [vmem:[%s5077_s5 + $0x138] sm:$0xff]  }
 0x1f6   :  { %v3789_v42 = vld [vmem:[%s5077_s5 + $0x1b8] sm:$0xff]  }
 0x1f7   :  { %3531 = vmatpush3.bf16.msra.mxu0 %v3752_v43  ;;  %v803_v43 = vsub.s32 4, %v4236_v13 }
 0x1f8   :  { %3553 = vmatpush3.bf16.msra.mxu1 %v3753_v44  ;;  %3532 = vmatprep.subr.bf16.mxu0 %v3754_v45  ;;  %v811_v44 = vsub.s32 6, %v4236_v13  ;;  %v807_v45 = vsub.s32 5, %v4236_v13 }
 0x1f9   :  { %3554 = vmatprep.subr.bf16.mxu1 %v3755_v46  ;;  %v815_v46 = vsub.s32 7, %v4236_v13 }
 0x1fb   :  { %3533 = vmatpush3.bf16.msra.mxu0 %v3756_v3  ;;  %v804_v3 = vrot.slane %v4955_v50, %v803_v43 }
 0x1fc   :  { %3555 = vmatpush3.bf16.msra.mxu1 %v3757_v47  ;;  %3562 = vmatprep.subr.bf16.mxu0 %v3758_v48  ;;  %v812_v47 = vrot.slane %v4955_v50, %v811_v44  ;;  %v808_v48 = vrot.slane %v4955_v50, %v807_v45 }
 0x1fd   :  { %3584 = vmatprep.subr.bf16.mxu1 %v3759_v49  ;;  %v816_v49 = vrot.slane %v4955_v50, %v815_v46 }
 0x231   :  { %v2180_v57 = vpop.f32.mrb[4].mxu0  ;;  %v2262_v58 = vpop.f32.mrb[4].mxu1 }
 0x232   :  { %v3606_v59 = vadd.f32 %v2180_v57, %v788_v51  ;;  %v3608_v60 = vadd.f32 %v2262_v58, %v796_v52  ;;  %v2182_v61 = vpop.f32.mrb[5].mxu0  ;;  %v2264_v62 = vpop.f32.mrb[5].mxu1 }
 0x233   :  { %v3607_v63 = vadd.f32 %v2182_v61, %v792_v53  ;;  %v3609_v14 = vadd.f32 %v2264_v62, %v800_v56  ;;  %v2184_v0 = vpop.f32.mrb[6].mxu0  ;;  %v2266_v1 = vpop.f32.mrb[6].mxu1 }
 0x234   :  { %v2433_v2 = vmax.f32 %v3606_v59, 0.0  ;;  %v2435_v20 = vmax.f32 %v3608_v60, 0.0  ;;  %v2185_v4 = vpop.f32.mrb[7].mxu0  ;;  %v2267_v5 = vpop.f32.mrb[7].mxu1 }
 0x235   :  { %v2434_v6 = vmax.f32 %v3607_v63, 0.0  ;;  %v2436_v16 = vmax.f32 %v3609_v14, 0.0 }
 0x236   :  { %v2441_v10 = vpack.c.bf16 %v2433_v2, %v2433_v2  ;;  %v2443_v11 = vpack.c.bf16 %v2435_v20, %v2435_v20 }
 0x237   :  { %v2442_v7 = vpack.c.bf16 %v2434_v6, %v2434_v6  ;;  %v2444_v8 = vpack.c.bf16 %v2436_v16, %v2436_v16 }
 0x239   :  { %3000 = vmatprep.mubr.bf16.mxu0 %v2442_v7  ;;  %3040 = vmatprep.mubr.bf16.mxu1 %v2444_v8  ;;  %v3453_v7 = vld [vmem:[%s5079_s6] ss:$0 sm:$0xff] }
 0x23a   :  { %3001 = vmatmul.mubr.bf16.vlgmr.msra.gmra.mrb[12].mxu0 %v2441_v10  ;;  %3041 = vmatmul.mubr.bf16.vlgmr.msra.gmra.mrb[12].mxu1 %v2443_v11 }
 0x23b   :  { %3563 = vmatpush3.bf16.msra.mxu0 %v3760_v55  ;;  %3585 = vmatpush3.bf16.msra.mxu1 %v3761_v9 }
 0x23c   :  { %3564 = vmatprep.subr.bf16.mxu0 %v3762_v12  ;;  %3586 = vmatprep.subr.bf16.mxu1 %v3763_v31 }
 0x23f   :  { %3565 = vmatpush3.bf16.msra.mxu0 %v3764_v17  ;;  %3587 = vmatpush3.bf16.msra.mxu1 %v3765_v18 }
 0x240   :  { %3566 = vmatprep.subr.bf16.mxu0 %v3766_v19  ;;  %3588 = vmatprep.subr.bf16.mxu1 %v3767_v21 }
 0x243   :  { %3567 = vmatpush3.bf16.msra.mxu0 %v3768_v22  ;;  %3589 = vmatpush3.bf16.msra.mxu1 %v3769_v23 }
 0x244   :  { %3568 = vmatprep.subr.bf16.mxu0 %v3770_v24  ;;  %3590 = vmatprep.subr.bf16.mxu1 %v3771_v25 }
 0x247   :  { %3569 = vmatpush3.bf16.msra.mxu0 %v3772_v26  ;;  %3591 = vmatpush3.bf16.msra.mxu1 %v3773_v54 }
 0x248   :  { %3570 = vmatprep.subr.bf16.mxu0 %v3774_v28  ;;  %3592 = vmatprep.subr.bf16.mxu1 %v3775_v29 }
 0x24b   :  { %3571 = vmatpush3.bf16.msra.mxu0 %v3776_v30  ;;  %3593 = vmatpush3.bf16.msra.mxu1 %v3777_v32 }
 0x24c   :  { %3572 = vmatprep.subr.bf16.mxu0 %v3778_v33  ;;  %3594 = vmatprep.subr.bf16.mxu1 %v3779_v27 }
 0x24f   :  { %3573 = vmatpush3.bf16.msra.mxu0 %v3780_v34  ;;  %3595 = vmatpush3.bf16.msra.mxu1 %v3781_v35 }
 0x250   :  { %3574 = vmatprep.subr.bf16.mxu0 %v3782_v36  ;;  %3596 = vmatprep.subr.bf16.mxu1 %v3783_v37 }
 0x253   :  { %3575 = vmatpush3.bf16.msra.mxu0 %v3784_v38  ;;  %3597 = vmatpush3.bf16.msra.mxu1 %v3785_v15 }
 0x254   :  { %3576 = vmatprep.subr.bf16.mxu0 %v3786_v39  ;;  %3598 = vmatprep.subr.bf16.mxu1 %v3787_v40 }
 0x257   :  { %3577 = vmatpush3.bf16.msra.mxu0 %v3788_v41  ;;  %3599 = vmatpush3.bf16.msra.mxu1 %v3789_v42 }
 0x2b1   :  { %v2344_v51 = vpop.f32.mrb[8].mxu0 }
 0x2b2   :  { %v3610_v52 = vadd.f32 %v2344_v51, %v804_v3  ;;  %v2426_v53 = vpop.f32.mrb[8].mxu1  ;;  %v2346_v56 = vpop.f32.mrb[9].mxu0 }
 0x2b3   :  { %v3612_v57 = vadd.f32 %v2426_v53, %v812_v47  ;;  %v3611_v58 = vadd.f32 %v2346_v56, %v808_v48  ;;  %v2428_v59 = vpop.f32.mrb[9].mxu1  ;;  %v2348_v60 = vpop.f32.mrb[10].mxu0 }
 0x2b4   :  { %v2437_v61 = vmax.f32 %v3610_v52, 0.0  ;;  %v3613_v62 = vadd.f32 %v2428_v59, %v816_v49  ;;  %v2430_v63 = vpop.f32.mrb[10].mxu1  ;;  %v2349_v13 = vpop.f32.mrb[11].mxu0 }
 0x2b5   :  { %v2439_v14 = vmax.f32 %v3612_v57, 0.0  ;;  %v2438_v0 = vmax.f32 %v3611_v58, 0.0  ;;  %v2431_v1 = vpop.f32.mrb[11].mxu1 }
 0x2b6   :  { %v2440_v2 = vmax.f32 %v3613_v62, 0.0  ;;  %v2445_v4 = vpack.c.bf16 %v2437_v61, %v2437_v61 }
 0x2b7   :  { %v2446_v20 = vpack.c.bf16 %v2438_v0, %v2438_v0  ;;  %v2447_v50 = vpack.c.bf16 %v2439_v14, %v2439_v14 }
 0x2b8   :  { %v2448_v5 = vpack.c.bf16 %v2440_v2, %v2440_v2 }
 0x2b9   :  { %3080 = vmatprep.mubr.bf16.mxu0 %v2446_v20 }
 0x2ba   :  { %3120 = vmatprep.mubr.bf16.mxu1 %v2448_v5  ;;  %3081 = vmatmul.mubr.bf16.vlgmr.msra.gmra.mrb[16].mxu0 %v2445_v4 }
 0x2bb   :  { %3121 = vmatmul.mubr.bf16.vlgmr.msra.gmra.mrb[16].mxu1 %v2447_v50 }
 0x30d   :  { %v3534_v6 = vpop.f32.mrb[12].mxu0  ;;  %v3556_v16 = vpop.f32.mrb[12].mxu1 }
 0x30e   :  { %v3535_v8 = vpop.f32.mrb[13].mxu0  ;;  %v3557_v55 = vpop.f32.mrb[13].mxu1 }
 0x30f   :  { %v3536_v9 = vadd.f32 %v3535_v8, %v3534_v6  ;;  %v3558_v10 = vadd.f32 %v3557_v55, %v3556_v16  ;;  %v3537_v11 = vpop.f32.mrb[14].mxu0  ;;  %v3559_v12 = vpop.f32.mrb[14].mxu1 }
 0x310   :  { %v3538_v31 = vpop.f32.mrb[15].mxu0  ;;  %v3560_v17 = vpop.f32.mrb[15].mxu1 }
 0x311   :  { %v3003_v18 = vadd.f32 %v3536_v9, %v3453_v7 }
 0x313   :  { %v3043_v19 = vadd.f32 %v3558_v10, %v3003_v18 }
 0x38d   :  { %v3578_v21 = vpop.f32.mrb[16].mxu0 }
 0x38e   :  { %v3600_v22 = vpop.f32.mrb[16].mxu1  ;;  %v3579_v23 = vpop.f32.mrb[17].mxu0 }
 0x38f   :  { %v3580_v24 = vadd.f32 %v3579_v23, %v3578_v21  ;;  %v3601_v25 = vpop.f32.mrb[17].mxu1  ;;  %v3581_v26 = vpop.f32.mrb[18].mxu0 }
 0x390   :  { %v3602_v54 = vadd.f32 %v3601_v25, %v3600_v22  ;;  %v3603_v28 = vpop.f32.mrb[18].mxu1  ;;  %v3582_v29 = vpop.f32.mrb[19].mxu0 }
 0x391   :  { %v3083_v30 = vadd.f32 %v3580_v24, %v3043_v19  ;;  %v3604_v32 = vpop.f32.mrb[19].mxu1 }
 0x393   :  { %v3123_v33 = vadd.f32 %v3602_v54, %v3083_v30 }
 0x395   :  { %3128 = vst [vmem:[%s5080_s7] sm:$0xff] %v3123_v33 }

</bundles_post_ra>
